<compile_context>
chip_gen: v6e
topology: v6e:2x2x1
jax: 0.10.0
libtpu: 0.0.40
codegen_flags: <defaults>
</compile_context>

<pallas_src>
import functools

import jax
import jax.numpy as jnp
from jax.experimental import pallas as pl
from jax.experimental.pallas import tpu as pltpu


def _vmem_capacity_bytes():
    """Best-effort per-core VMEM capacity (conservative v7x default)."""
    cap = 64 << 20
    try:
        info = pltpu.get_tpu_info()
        cap = int(getattr(info, "vmem_capacity_bytes", cap))
    except Exception:
        pass
    return cap


def _plan_tiling(N, D, H_pad, H, budget_bytes):
    """Pick (row_tile Ti, cache_conv) for the per-step VMEM working set."""
    it = 4  # f32
    # Per-batch residents: z block (double-buffered) + both weight buffers.
    fixed = 2 * N * D * it + 2 * (2 * D) * H_pad * it + (64 << 10)
    # Per-row working set (f32): broadcast temps + dif/mul halves + concat
    # feature (~4 x 2D), padded matmul output + transposed copy (~2 x H_pad),
    # cached/normalized/squared temps + double-buffered output block (~4 x H).
    # Already includes ~2x headroom for compiler-materialized intermediates.
    per_row = N * it * (4 * (2 * D) + 2 * H_pad + 4 * H)
    cache_bytes = N * N * H * it
    # Cache the whole per-batch conv output (kills the p==1 recompute) only if
    # it still leaves room for at least a 16-row tile working set.
    cache_conv = fixed + cache_bytes + 16 * per_row <= budget_bytes
    avail = budget_bytes - fixed - (cache_bytes if cache_conv else 0)

    if N % 8 != 0:
        # TODO(synk): ragged/padded row tiles; one full-size tile for small N.
        return N, cache_conv

    ti = max(8, min(N, (avail // per_row) // 8 * 8))
    while ti >= 8:
        if N % ti == 0 and (ti * N) % 128 == 0:
            return ti, cache_conv
        ti -= 8
    # Fallback: one full-size row tile (block == full array dims, always legal).
    return N, cache_conv


def _fc1_kernel(z_ref, w_ref, o_ref, sum_ref, ssq_ref, conv_ref, *, cache_conv):
    # z_ref   : (1, N, D)      one batch of embeddings (resident per batch)
    # w_ref   : (2D, H_pad)    concatenated 1x1-conv weight, rows = [dif | mul]
    # o_ref   : (1, H, Ti*N)   NCHW output row-tile (flat spatial), p==1 only
    # sum_ref : (H, 1)         per-channel running sum
    # ssq_ref : (H, 1)         per-channel running sum of squares
    # conv_ref: (T, H, Ti*N)   cached unnormalized conv tiles (or tiny dummy)
    p = pl.program_id(1)   # 0: stats pass, 1: normalize/write pass
    t = pl.program_id(2)   # row-tile index

    N = z_ref.shape[1]
    D = z_ref.shape[2]
    H = o_ref.shape[1]
    M = o_ref.shape[2]     # = Ti * N
    Ti = M // N

    @pl.when(jnp.logical_and(p == 0, t == 0))
    def _init():
        sum_ref[...] = jnp.zeros_like(sum_ref)
        ssq_ref[...] = jnp.zeros_like(ssq_ref)

    start = t * Ti
    if Ti % 8 == 0:
        start = pl.multiple_of(start, 8)

    def conv_tile_cf():
        """Unnormalized conv output for this row tile, channels-first (H, M)."""
        zi = z_ref[0, pl.ds(start, Ti), :]                     # (Ti, D)
        zj = z_ref[0]                                          # (N, D)
        # Hoisted broadcasts shared by the abs-diff and the product.
        zi_b = jnp.broadcast_to(zi[:, None, :], (Ti, N, D))
        zj_b = jnp.broadcast_to(zj[None, :, :], (Ti, N, D))
        # Lane-dense concatenated features: (Ti, N, 2D), 2D = 128 on lanes.
        feat = jnp.concatenate([jnp.abs(zi_b - zj_b), zi_b * zj_b], axis=-1)
        feat2d = feat.reshape(M, 2 * D)                        # leading-dim merge
        # 1x1 conv == single K=2D matmul; bias dropped (cancelled by the norm).
        out_nl = jnp.dot(feat2d, w_ref[...],
                         preferred_element_type=jnp.float32)   # (M, H_pad)
        # Aligned 2D transpose to NCHW orientation; drop the padded channels.
        return jnp.transpose(out_nl)[:H, :]                    # (H, M)

    @pl.when(p == 0)
    def _stats_pass():
        out_cf = conv_tile_cf()
        if cache_conv:
            conv_ref[t] = out_cf
        sum_ref[...] += jnp.sum(out_cf, axis=1, keepdims=True)
        ssq_ref[...] += jnp.sum(out_cf * out_cf, axis=1, keepdims=True)

    @pl.when(p == 1)
    def _write_pass():
        out_cf = conv_ref[t] if cache_conv else conv_tile_cf()
        inv_count = 1.0 / float(N * N)
        mean = sum_ref[...] * inv_count                        # (H, 1)
        # One-pass biased variance, clamped (>=0).  TODO(synk): shifted /
        # Welford accumulation if very large N*N ever strains f32 precision.
        var = jnp.maximum(ssq_ref[...] * inv_count - mean * mean, 0.0)
        scale = jax.lax.rsqrt(var + 1e-5)
        normed = jnp.maximum((out_cf - mean) * scale, 0.0)     # (H, M) NCHW rows
        o_ref[...] = normed.reshape(o_ref.shape)


def fully_connected1(z0, conv_weight, conv_bias=None):
    """z0: (B, N, D) float32; conv_weight: (H, 2D, 1, 1); conv_bias: (H,) (unused).
    Returns (B, H, N, N) float32 (same as the PyTorch module output)."""
    del conv_bias  # exactly cancelled by the no-affine InstanceNorm mean subtraction
    B, N, D = z0.shape
    H = conv_weight.shape[0]

    # 1x1-conv weight as a single (2D, H_pad) matmul operand, rows = [dif | mul].
    # H is padded to a lane multiple so the in-kernel transpose stays on fully
    # (8, 128)-aligned shapes; the zero-padded channels are sliced away inside
    # the kernel and cost nothing on the (128-wide) MXU.
    H_pad = ((H + 127) // 128) * 128
    w = jnp.transpose(conv_weight[:, :, 0, 0]).astype(jnp.float32)   # (2D, H)
    w_pad = jnp.zeros((2 * D, H_pad), jnp.float32).at[:, :H].set(w)

    cap = _vmem_capacity_bytes()
    budget = min(int(cap * 0.70), 96 << 20)
    vmem_limit = min(int(cap * 0.85), 112 << 20)
    Ti, cache_conv = _plan_tiling(N, D, H_pad, H, budget)
    T = N // Ti
    M = Ti * N

    conv_cache_shape = (T, H, M) if cache_conv else (1, 8, 128)
    kernel = functools.partial(_fc1_kernel, cache_conv=cache_conv)

    out_flat = pl.pallas_call(
        kernel,
        out_shape=jax.ShapeDtypeStruct((B, H, N * N), jnp.float32),
        grid_spec=pltpu.PrefetchScalarGridSpec(
            num_scalar_prefetch=0,
            grid=(B, 2, T),
            in_specs=[
                pl.BlockSpec((1, N, D), lambda b, p, t: (b, 0, 0)),
                pl.BlockSpec((2 * D, H_pad), lambda b, p, t: (0, 0)),
            ],
            # NOTE: during the stats pass (p == 0) the output block index is
            # pinned to 0, so the not-yet-written block is never flushed: the
            # visits to block (b, 0) are consecutive (end of p == 0 flows
            # straight into p == 1, t == 0, which fully overwrites it before
            # the index changes).  This relies on the sequential order of the
            # p / t grid axes -- do NOT mark them "parallel".
            out_specs=pl.BlockSpec((1, H, M), lambda b, p, t: (b, 0, t * p)),
            scratch_shapes=[
                pltpu.VMEM((H, 1), jnp.float32),            # running sum
                pltpu.VMEM((H, 1), jnp.float32),            # running sum of squares
                pltpu.VMEM(conv_cache_shape, jnp.float32),  # cached conv tiles
            ],
        ),
        compiler_params=pltpu.CompilerParams(
            dimension_semantics=("parallel", "arbitrary", "arbitrary"),
            vmem_limit_bytes=int(vmem_limit)),
    )(z0.astype(jnp.float32), w_pad)

    # Free reshape: (B, H, N*N) and (B, H, N, N) share the same row-major bytes.
    return out_flat.reshape(B, H, N, N)


def _reference(z0, conv_weight, conv_bias):
    """Pure-JAX reference mirroring the PyTorch forward exactly (incl. bias)."""
    z = jnp.transpose(z0, (0, 2, 1))                       # (B, D, N)
    z_dif = jnp.abs(z[:, :, :, None] - z[:, :, None, :])   # (B, D, N, N)
    z_mul = z[:, :, :, None] * z[:, :, None, :]
    z_cat = jnp.concatenate([z_dif, z_mul], axis=1)        # (B, 2D, N, N)
    w = conv_weight[:, :, 0, 0]                            # (H, 2D)
    b = jnp.einsum('hc,bcij->bhij', w, z_cat) + conv_bias[None, :, None, None]
    mean = jnp.mean(b, axis=(2, 3), keepdims=True)
    var = jnp.var(b, axis=(2, 3), keepdims=True)           # biased var
    bn = (b - mean) / jnp.sqrt(var + 1e-5)
    return jnp.maximum(bn, 0.0)


if __name__ == "__main__":
    B, N, D, H = 2, 16, 64, 64   # embed_dim=64, hidden_dim=64 (module defaults)

    key = jax.random.PRNGKey(0)
    k_z, k_w, k_b = jax.random.split(key, 3)

    z0 = jax.random.normal(k_z, (B, N, D), dtype=jnp.float32)
    conv_weight = 0.05 * jax.random.normal(k_w, (H, 2 * D, 1, 1), dtype=jnp.float32)
    conv_bias = 0.05 * jax.random.normal(k_b, (H,), dtype=jnp.float32)

    out = fully_connected1(z0, conv_weight, conv_bias)
    out = jax.block_until_ready(out)

    ref = _reference(z0, conv_weight, conv_bias)
    assert out.shape == (B, H, N, N), out.shape
    assert jnp.allclose(out, ref, rtol=1e-4, atol=1e-4), "mismatch vs reference"

    print("KERNEL_OK")
</pallas_src>

<mosaic_0001>
module attributes {stable_mosaic.version = 11 : i64} {
  func.func @_fc1_kernel(%arg0: i32, %arg1: i32, %arg2: i32, %arg3: memref<1x16x64xf32, #tpu.memory_space<vmem>>, %arg4: memref<128x128xf32, #tpu.memory_space<vmem>>, %arg5: memref<1x64x256xf32, #tpu.memory_space<vmem>>, %arg6: memref<64x1xf32, #tpu.memory_space<vmem>>, %arg7: memref<64x1xf32, #tpu.memory_space<vmem>>, %arg8: memref<1x64x256xf32, #tpu.memory_space<vmem>>) attributes {dimension_semantics = [#tpu.dimension_semantics<parallel>, #tpu.dimension_semantics<arbitrary>, #tpu.dimension_semantics<arbitrary>], iteration_bounds = array<i64: 2, 2, 1>, scalar_prefetch = 0 : i64, scratch_operands = 3 : i64, tpu.core_type = #tpu.core_type<tc>, window_params = [{transform_indices = @transform_0, window_bounds = array<i64: 1, 16, 64>}, {pipeline_mode = #tpu.pipeline_mode<synchronous>, transform_indices = @transform_1, window_bounds = array<i64: 128, 128>}, {transform_indices = @transform_2, window_bounds = array<i64: 1, 64, 256>}]} {
    %c0_i32 = arith.constant 0 : i32
    %0 = arith.cmpi eq, %arg1, %c0_i32 : i32
    %c0_i32_0 = arith.constant 0 : i32
    %1 = arith.cmpi eq, %arg2, %c0_i32_0 : i32
    %2 = arith.andi %0, %1 : i1
    %3 = arith.extui %2 : i1 to i32
    %c0_i32_1 = arith.constant 0 : i32
    %4 = arith.cmpi ne, %3, %c0_i32_1 : i32
    scf.if %4 {
      %cst = arith.constant 0.000000e+00 : f32
      %13 = vector.broadcast %cst : f32 to vector<64x1xf32>
      %c0 = arith.constant 0 : index
      %c0_5 = arith.constant 0 : index
      %14 = vector.load %arg6[%c0, %c0_5] : memref<64x1xf32, #tpu.memory_space<vmem>>, vector<64x1xf32>
      tpu.vector_store %arg6[%c0, %c0_5], %13 {strides = array<i32>} : memref<64x1xf32, #tpu.memory_space<vmem>>, vector<64x1xf32>,
      %cst_6 = arith.constant 0.000000e+00 : f32
      %15 = vector.broadcast %cst_6 : f32 to vector<64x1xf32>
      %c0_7 = arith.constant 0 : index
      %c0_8 = arith.constant 0 : index
      %16 = vector.load %arg7[%c0_7, %c0_8] : memref<64x1xf32, #tpu.memory_space<vmem>>, vector<64x1xf32>
      tpu.vector_store %arg7[%c0_7, %c0_8], %15 {strides = array<i32>} : memref<64x1xf32, #tpu.memory_space<vmem>>, vector<64x1xf32>,
    } else {
    }
    %c16_i32 = arith.constant 16 : i32
    %5 = arith.muli %arg2, %c16_i32 : i32
    %6 = tpu.assume_multiple %5, 8 : i32
    %c0_i32_2 = arith.constant 0 : i32
    %7 = arith.cmpi eq, %arg1, %c0_i32_2 : i32
    %8 = arith.extui %7 : i1 to i32
    %c0_i32_3 = arith.constant 0 : i32
    %9 = arith.cmpi ne, %8, %c0_i32_3 : i32
    scf.if %9 {
      %c0 = arith.constant 0 : index
      %13 = arith.index_cast %6 : i32 to index
      %c0_5 = arith.constant 0 : index
      %14 = vector.load %arg3[%c0, %13, %c0_5] : memref<1x16x64xf32, #tpu.memory_space<vmem>>, vector<1x16x64xf32>
      %15 = vector.shape_cast %14 : vector<1x16x64xf32> to vector<16x64xf32>
      %c0_6 = arith.constant 0 : index
      %c0_7 = arith.constant 0 : index
      %c0_8 = arith.constant 0 : index
      %16 = vector.load %arg3[%c0_6, %c0_7, %c0_8] : memref<1x16x64xf32, #tpu.memory_space<vmem>>, vector<1x16x64xf32>
      %17 = vector.shape_cast %16 : vector<1x16x64xf32> to vector<16x64xf32>
      %18 = vector.shape_cast %15 : vector<16x64xf32> to vector<16x1x64xf32>
      %19 = vector.shape_cast %18 : vector<16x1x64xf32> to vector<16x1x64xf32>
      %20 = vector.broadcast %19 : vector<16x1x64xf32> to vector<16x16x64xf32>
      %21 = vector.shape_cast %17 : vector<16x64xf32> to vector<1x16x64xf32>
      %22 = vector.shape_cast %21 : vector<1x16x64xf32> to vector<1x16x64xf32>
      %23 = vector.broadcast %22 : vector<1x16x64xf32> to vector<16x16x64xf32>
      %24 = arith.subf %20, %23 : vector<16x16x64xf32>
      %25 = math.absf %24 : vector<16x16x64xf32>
      %26 = arith.mulf %20, %23 : vector<16x16x64xf32>
      %27 = tpu.concatenate %25, %26 in 2 : vector<16x16x64xf32>, vector<16x16x64xf32> -> vector<16x16x128xf32>
      %28 = vector.shape_cast %27 : vector<16x16x128xf32> to vector<256x128xf32>
      %c0_9 = arith.constant 0 : index
      %c0_10 = arith.constant 0 : index
      %29 = vector.load %arg4[%c0_9, %c0_10] : memref<128x128xf32, #tpu.memory_space<vmem>>, vector<128x128xf32>
      %cst = arith.constant dense<0.000000e+00> : vector<256x128xf32>
      %30 = tpu.matmul %28, %29, %cst {dimension_numbers = #tpu.dot_dimension_numbers<[1], [0], [0], [1], [0, 0, 1, 1], [], []>} : vector<256x128xf32>, vector<128x128xf32>, vector<256x128xf32> -> vector<256x128xf32>
      %31 = tpu.transpose %30, [1, 0] : vector<256x128xf32> -> vector<128x256xf32>
      %32 = vector.extract_strided_slice %31 {offsets = [0, 0], sizes = [64, 256], strides = [1, 1]} : vector<128x256xf32> to vector<64x256xf32>
      %33 = arith.index_cast %arg2 : i32 to index
      %c0_11 = arith.constant 0 : index
      %c0_12 = arith.constant 0 : index
      %34 = vector.load %arg8[%33, %c0_11, %c0_12] : memref<1x64x256xf32, #tpu.memory_space<vmem>>, vector<1x64x256xf32>
      %35 = vector.shape_cast %34 : vector<1x64x256xf32> to vector<64x256xf32>
      %36 = vector.shape_cast %32 : vector<64x256xf32> to vector<1x64x256xf32>
      tpu.vector_store %arg8[%33, %c0_11, %c0_12], %36 {strides = array<i32>} : memref<1x64x256xf32, #tpu.memory_space<vmem>>, vector<1x64x256xf32>,
      %c0_13 = arith.constant 0 : index
      %c0_14 = arith.constant 0 : index
      %37 = vector.load %arg6[%c0_13, %c0_14] : memref<64x1xf32, #tpu.memory_space<vmem>>, vector<64x1xf32>
      %cst_15 = arith.constant dense<0.000000e+00> : vector<64xf32>
      %38 = vector.multi_reduction <add>, %32, %cst_15 [1] : vector<64x256xf32> to vector<64xf32>
      %39 = vector.shape_cast %38 : vector<64xf32> to vector<64x1xf32>
      %40 = arith.addf %37, %39 : vector<64x1xf32>
      %c0_16 = arith.constant 0 : index
      %c0_17 = arith.constant 0 : index
      %41 = vector.load %arg6[%c0_16, %c0_17] : memref<64x1xf32, #tpu.memory_space<vmem>>, vector<64x1xf32>
      tpu.vector_store %arg6[%c0_16, %c0_17], %40 {strides = array<i32>} : memref<64x1xf32, #tpu.memory_space<vmem>>, vector<64x1xf32>,
      %c0_18 = arith.constant 0 : index
      %c0_19 = arith.constant 0 : index
      %42 = vector.load %arg7[%c0_18, %c0_19] : memref<64x1xf32, #tpu.memory_space<vmem>>, vector<64x1xf32>
      %43 = arith.mulf %32, %32 : vector<64x256xf32>
      %cst_20 = arith.constant dense<0.000000e+00> : vector<64xf32>
      %44 = vector.multi_reduction <add>, %43, %cst_20 [1] : vector<64x256xf32> to vector<64xf32>
      %45 = vector.shape_cast %44 : vector<64xf32> to vector<64x1xf32>
      %46 = arith.addf %42, %45 : vector<64x1xf32>
      %c0_21 = arith.constant 0 : index
      %c0_22 = arith.constant 0 : index
      %47 = vector.load %arg7[%c0_21, %c0_22] : memref<64x1xf32, #tpu.memory_space<vmem>>, vector<64x1xf32>
      tpu.vector_store %arg7[%c0_21, %c0_22], %46 {strides = array<i32>} : memref<64x1xf32, #tpu.memory_space<vmem>>, vector<64x1xf32>,
    } else {
    }
    %c1_i32 = arith.constant 1 : i32
    %10 = arith.cmpi eq, %arg1, %c1_i32 : i32
    %11 = arith.extui %10 : i1 to i32
    %c0_i32_4 = arith.constant 0 : i32
    %12 = arith.cmpi ne, %11, %c0_i32_4 : i32
    scf.if %12 {
      %13 = arith.index_cast %arg2 : i32 to index
      %c0 = arith.constant 0 : index
      %c0_5 = arith.constant 0 : index
      %14 = vector.load %arg8[%13, %c0, %c0_5] : memref<1x64x256xf32, #tpu.memory_space<vmem>>, vector<1x64x256xf32>
      %15 = vector.shape_cast %14 : vector<1x64x256xf32> to vector<64x256xf32>
      %c0_6 = arith.constant 0 : index
      %c0_7 = arith.constant 0 : index
      %16 = vector.load %arg6[%c0_6, %c0_7] : memref<64x1xf32, #tpu.memory_space<vmem>>, vector<64x1xf32>
      %cst = arith.constant 3.906250e-03 : f32
      %17 = vector.broadcast %cst : f32 to vector<64x1xf32>
      %18 = arith.mulf %16, %17 : vector<64x1xf32>
      %c0_8 = arith.constant 0 : index
      %c0_9 = arith.constant 0 : index
      %19 = vector.load %arg7[%c0_8, %c0_9] : memref<64x1xf32, #tpu.memory_space<vmem>>, vector<64x1xf32>
      %cst_10 = arith.constant 3.906250e-03 : f32
      %20 = vector.broadcast %cst_10 : f32 to vector<64x1xf32>
      %21 = arith.mulf %19, %20 : vector<64x1xf32>
      %22 = arith.mulf %18, %18 : vector<64x1xf32>
      %23 = arith.subf %21, %22 : vector<64x1xf32>
      %cst_11 = arith.constant 0.000000e+00 : f32
      %24 = vector.broadcast %cst_11 : f32 to vector<64x1xf32>
      %25 = arith.maximumf %23, %24 : vector<64x1xf32>
      %cst_12 = arith.constant 9.99999974E-6 : f32
      %26 = vector.broadcast %cst_12 : f32 to vector<64x1xf32>
      %27 = arith.addf %25, %26 : vector<64x1xf32>
      %28 = math.rsqrt %27 : vector<64x1xf32>
      %29 = vector.broadcast %18 : vector<64x1xf32> to vector<64x256xf32>
      %30 = arith.subf %15, %29 : vector<64x256xf32>
      %31 = vector.broadcast %28 : vector<64x1xf32> to vector<64x256xf32>
      %32 = arith.mulf %30, %31 : vector<64x256xf32>
      %cst_13 = arith.constant 0.000000e+00 : f32
      %33 = vector.broadcast %cst_13 : f32 to vector<64x256xf32>
      %34 = arith.maximumf %32, %33 : vector<64x256xf32>
      %35 = vector.shape_cast %34 : vector<64x256xf32> to vector<1x64x256xf32>
      %c0_14 = arith.constant 0 : index
      %c0_15 = arith.constant 0 : index
      %c0_16 = arith.constant 0 : index
      %36 = vector.load %arg5[%c0_14, %c0_15, %c0_16] : memref<1x64x256xf32, #tpu.memory_space<vmem>>, vector<1x64x256xf32>
      tpu.vector_store %arg5[%c0_14, %c0_15, %c0_16], %35 {strides = array<i32>} : memref<1x64x256xf32, #tpu.memory_space<vmem>>, vector<1x64x256xf32>,
    } else {
    }
    return
  }
  func.func @transform_0(%arg0: i32, %arg1: i32, %arg2: i32) -> (i32, i32, i32) {
    %c0_i32 = arith.constant 0 : i32
    %c0_i32_0 = arith.constant 0 : i32
    %c0_i32_1 = arith.constant 0 : i32
    return %arg0, %c0_i32, %c0_i32_0 : i32, i32, i32
  }
  func.func @transform_1(%arg0: i32, %arg1: i32, %arg2: i32) -> (i32, i32) {
    %c0_i32 = arith.constant 0 : i32
    %c0_i32_0 = arith.constant 0 : i32
    %c0_i32_1 = arith.constant 0 : i32
    return %c0_i32, %c0_i32_0 : i32, i32
  }
  func.func @transform_2(%arg0: i32, %arg1: i32, %arg2: i32) -> (i32, i32, i32) {
    %0 = arith.muli %arg2, %arg1 : i32
    %c0_i32 = arith.constant 0 : i32
    %c0_i32_0 = arith.constant 0 : i32
    return %arg0, %c0_i32, %0 : i32, i32, i32
  }
}

</mosaic_0001>

<bundles_post_ra>
// kernel: tpu_custom_call.1
= control target key start
LH: loop header
LB: loop body
LE: loop exit
PB: predicated region body
PF: predicated region fallthrough
CT: control target
= control target key end

     0   :  { %7 = vsyncpa [#allocation6], 0  ;;  %s2675_s0 = inlined_call_operand.hbm [shape: f32[2,16,64], index: 0, kind: input, shape index: {}]   ;;  %s2676_s1 = inlined_call_operand.hbm [shape: f32[128,128], index: 1, kind: input, shape index: {}]   ;;  %s2677_s2 = inlined_call_operand.hbm [shape: f32[2,64,256], index: 2, kind: output, shape index: {}]  }
   0x1   :  { %9 = vsyncpa [#allocation6 + $0x1], 0 }
   0x2   :  { %10 = vsyncpa [#allocation9], 0 }
   0x3   :  { %11 = vsyncpa [#allocation7], 0 }
   0x4   :  { %13 = vsyncpa [#allocation7 + $0x1], 0  ;;  %s2030_s9 = smov 0   ;;  %s2032_s10 = smov 0  }
   0x5   :  { %s2034_s11 = smov 0   ;;  %s2036_s12 = smov 0  }
   0x6   :  { %s2038_s13 = smov 0   ;;  %s2040_s14 = smov 0  }
   0x7   :  { %s2042_s15 = smov 0   ;;  %s2044_s16 = smov 0  }
   0x8 LB: > { %s1468_s17 = sadd.s32 4294967295, %s2002_s16   ;;  %s1469_s18 = sadd.s32 4294967294, %s2002_s16   ;;  %s2002_s16 = sphi %s2044_s16, %s19_s16   ;;  %s1998_s15 = sphi %s2042_s15, %s2698_s15   ;;  %s1994_s14 = sphi %s2040_s14, %s2697_s14   ;;  %s1990_s13 = sphi %s2038_s13, %s2696_s13   ;;  %s1986_s12 = sphi %s2036_s12, %s2695_s12   ;;  %s1982_s11 = sphi %s2034_s11, %s2694_s11   ;;  %s1978_s10 = sphi %s2032_s10, %s2693_s10   ;;  %s1974_s9 = sphi %s2030_s9, %s2692_s9  }
   0x9   : > { %p58_p0 = scmp.ne.s32.totalorder %s1978_s10, %s1974_s9  ;;  %p2074_p1 = scmp.eq.s32.totalorder %s1468_s17, 0 }
   0xa   : > { %p2078_p2 = scmp.eq.s32.totalorder %s1468_s17, 3  ;;  %p113_p3 = scmp.eq.s32.totalorder %s1469_s18, 3 }
   0xb   : > { %p2084_p4 = por %p2074_p1, %p58_p0  ;;  %p1470_p5 = scmp.ge.s32.totalorder %s2002_s16, 1 }
   0xc   : > { %p2089_p6 = por %p113_p3, %p58_p0  ;;  %p120_p7 = scmp.lt.s32.totalorder %s2002_s16, 5 }
   0xd   : > { %s2683_s21 = scalar_select %p2084_p4, 1, 0 }
   0xe   : > { %s2684_s22 = scalar_select %p2089_p6, 1, 0 }
   0xf   : > { %p2094_p8 = pnand %p1470_p5, %p120_p7  ;;  %s2004_s24 = smov [#allocation8]  }
  0x10   : > { %s132_s25 = sshll.u32 %s2004_s24, 4  ;;  %s133_s25 = int_to_ptr.vmem [resolvable:$true] %s132_s25 }
  0x11   : > { %p1659_p9 = pneg %p2094_p8  ;;  %s1859_s26 = scalar_lea.vmem %s133_s25, 2048 }
  0x12   : > { %p1860_p12 = scmp.ne.s32.totalorder %s133_s25, %s1859_s26  ;;  %p1867_p3 = scmp.lt.s32.totalorder %s133_s25, %s133_s25 }
  0x13   : > { %p1660_p10 = pnand %p1659_p9, %p2074_p1  ;;  %p1868_p6 = scmp.lt.s32.totalorder %s1859_s26, %s1859_s26 }
  0x15   : > { %p1850_p11 = pneg %p1660_p10  ;;  %p1869_p4 = por %p1868_p6, %p1867_p3 }
  0x17   : > { %p1862_p13 = pnand %p1860_p12, %p1850_p11 }
  0x19   : > { %p1863_p0 = pneg %p1862_p13 }
  0x1b   : > { %p1870_p5 = pnand %p1869_p4, %p1863_p0 }
  0x1d   : > { %1873 = shalt.err (!%p1870_p5)
}
  0x1e   : > { %s2679_s27 = smov 128   ;;  %s2680_s28 = smov 8  }
  0x1f   : > { %1662 = dma.hbm_to_vmem [thread:$0]  (!%p1660_p10), %s2676_s1, 2048, %s133_s25, [#allocation9], %s2679_s27, %s2679_s27, %s2680_s28  }
  0x20   : > { %s34_s3 = sadd.s32 1, %s1994_s14  ;;  %s38_s4 = sadd.s32 1, %s1998_s15 }
  0x21   : > { %p36_p4 = scmp.ge.s32.totalorder %s34_s3, 2  ;;  %s45_s5 = sadd.s32 1, %s1982_s11 }
  0x22   : > { %p52_p6 = scmp.ne.s32.totalorder %s1982_s11, %s1978_s10  ;;  %p53_p7 = scmp.eq.s32.totalorder %s2002_s16, 0 }
  0x23   : > { %s2700_s3 = smov (%p36_p4, %s34_s3), 0  ;;  %s2702_s4 = smov (!%p36_p4, %s38_s4), %s1998_s15 }
  0x24   : > { %p2119_p9 = por %p2078_p2, %p52_p6  ;;  %p40_p11 = scmp.ge.s32.totalorder %s2702_s4, 2 }
  0x25   : > { %p1672_p10 = scmp.lt.s32.totalorder %s2002_s16, 4  ;;  %p54_p12 = por %p53_p7, %p52_p6 }
  0x26   : > { %s146_s7 = sand.u32 1, %s1982_s11   ;;  %s2704_s4 = smov (%p40_p11, %s2702_s4), 0 }
  0x27   : > { %s1473_s8 = sshll.u32 %s146_s7, 4  ;;  %s42_s17 = ssub.s32 %s1998_s15, %s2704_s4 }
  0x28   : > { %p43_p13 = scmp.eq.s32.totalorder %s42_s17, 0  ;;  %s1488_s18 = sshll.u32 %s1998_s15, 8 }
  0x29   : > { %s156_s20 = scalar_lea.hbm %s2675_s0, %s1488_s18  ;;  %s150_s26 = scalar_lea.vmem [#allocation5], %s1473_s8 }
  0x2a   : > { %s157_s29 = sshll.u32 %s150_s26, 4  ;;  %p2138_p2 = pnand %p1672_p10, %p54_p12  ;;  %s158_s29 = int_to_ptr.vmem [resolvable:$true] %s157_s29 }
  0x2b   : > { %s2134_s30 = scalar_select %p43_p13, %s1982_s11, %s45_s5  }
  0x2c   : > { %s147_s28 = scalar_lea.sflag [#allocation6], %s146_s7  ;;  %p1876_p0 = pneg %p2138_p2 }
  0x2d   : > { %s1887_s17 = scalar_lea.vmem %s158_s29, 256  ;;  %s2007_s24 = smov [#allocation5]  }
  0x2e   : > { %p1888_p3 = scmp.ne.s32.totalorder %s158_s29, %s1887_s17  ;;  %s1892_s18 = sshll.u32 %s2007_s24, 4  ;;  %s1893_s18 = int_to_ptr.vmem [resolvable:$false] %s1892_s18 }
  0x2f   : > { %s1894_s8 = scalar_lea.vmem %s1893_s18, 512  ;;  %p1895_p6 = scmp.lt.s32.totalorder %s158_s29, %s1893_s18 }
  0x30   : > { %p1890_p5 = pnand %p1888_p3, %p1876_p0  ;;  %p1896_p7 = scmp.lt.s32.totalorder %s1894_s8, %s1887_s17 }
  0x32   : > { %p1891_p4 = pneg %p1890_p5  ;;  %p1897_p11 = por %p1896_p7, %p1895_p6 }
  0x34   : > { %p1898_p13 = pnand %p1897_p11, %p1891_p4 }
  0x36   : > { %1901 = shalt.err (!%p1898_p13)
}
  0x37   : > { %s2688_s5 = smov 8   ;;  %s2689_s25 = smov 128  }
  0x38   : > { %1666 = dma.hbm_to_vmem [thread:$0]  (!%p2138_p2), %s156_s20, 256, %s158_s29, %s147_s28, %s2689_s25, %s2689_s25, %s2688_s5  }
  0x39   : > { %169 = sbr.rel (%p2094_p8) target bundleno = 917 (0x395), region = 28  ;;  %s2152_s7 = sand.u32 (!%p2094_p8), 1, %s1978_s10  }
  0x3a   : > { %s1477_s26 = sshll.u32 (!%p2094_p8), %s2152_s7, 4  ;;  %s172_s17 = scalar_lea.sflag (!%p2094_p8), [#allocation6], %s2152_s7 }
  0x3b   : > { %s2156_s24 = scalar_lea.vmem (!%p2094_p8), [#allocation5], %s1477_s26  ;;  %p2690_p10 = scmp.ne.s32.totalorder (!%p2094_p8), %s2683_s21, 0 }
  0x3e   : > { %1961 = dma.done.wait (%p2690_p10), %s172_s17, 256  }
  0x3f   : > { %1963 = vsyncadd (%p2690_p10), %s172_s17, 4294967040 }
  0x40   : > { %1965 = dma.done.wait (%p2074_p1), [#allocation9], 2048  }
  0x41   : > { %1967 = vsyncadd (%p2074_p1), [#allocation9], 4294965248  ;;  %s1479_s23 = sshll.u32 %s2152_s7, 7  ;;  %p202_p8 = scmp.eq.s32.totalorder %s1986_s12, 0 }
  0x42   : > { %s2168_s27 = scalar_lea.vmem [#allocation10], %s1479_s23  ;;  %vm208_vm0 = vcmask (%p202_p8), 7168   ;;  %v2008_v0 = vmov (%p202_p8), 0.0  }
  0x43   : > { %207 = sbr.rel (!%p202_p8) target bundleno = 75 (0x4b), region = 40  ;;  %209 = vst.msk [vmem:[#allocation2] sm:$0xff] (%p202_p8), %vm208_vm0, %v2008_v0  ;;  %210 = vst.msk [vmem:[#allocation2 + $0x8] sm:$0xff] (%p202_p8), %vm208_vm0, %v2008_v0 }
  0x44   : > { %211 = vst.msk [vmem:[#allocation2 + $0x10] sm:$0xff] (%p202_p8), %vm208_vm0, %v2008_v0  ;;  %212 = vst.msk [vmem:[#allocation2 + $0x18] sm:$0xff] (%p202_p8), %vm208_vm0, %v2008_v0 }
  0x45   : > { %213 = vst.msk [vmem:[#allocation2 + $0x20] sm:$0xff] (%p202_p8), %vm208_vm0, %v2008_v0  ;;  %214 = vst.msk [vmem:[#allocation2 + $0x28] sm:$0xff] (%p202_p8), %vm208_vm0, %v2008_v0 }
  0x46   : > { %215 = vst.msk [vmem:[#allocation2 + $0x30] sm:$0xff] (%p202_p8), %vm208_vm0, %v2008_v0  ;;  %216 = vst.msk [vmem:[#allocation2 + $0x38] sm:$0xff] (%p202_p8), %vm208_vm0, %v2008_v0 }
  0x47   : > { %217 = vst.msk [vmem:[#allocation3] sm:$0xff] (%p202_p8), %vm208_vm0, %v2008_v0  ;;  %218 = vst.msk [vmem:[#allocation3 + $0x8] sm:$0xff] (%p202_p8), %vm208_vm0, %v2008_v0 }
  0x48   : > { %219 = vst.msk [vmem:[#allocation3 + $0x10] sm:$0xff] %vm208_vm0, %v2008_v0  ;;  %220 = vst.msk [vmem:[#allocation3 + $0x18] sm:$0xff] %vm208_vm0, %v2008_v0 }
  0x49   : > { %221 = vst.msk [vmem:[#allocation3 + $0x20] sm:$0xff] %vm208_vm0, %v2008_v0  ;;  %222 = vst.msk [vmem:[#allocation3 + $0x28] sm:$0xff] %vm208_vm0, %v2008_v0 }
  0x4a   : > { %223 = vst.msk [vmem:[#allocation3 + $0x30] sm:$0xff] %vm208_vm0, %v2008_v0  ;;  %224 = vst.msk [vmem:[#allocation3 + $0x38] sm:$0xff] %vm208_vm0, %v2008_v0 }
  0x4b PF: > { %p1481_p1 = scmp.ne.s32.totalorder %s1986_s12, 0 }
  0x4c   : > { %s2010_s19 = smov (!%p1481_p1), 64  }
  0x4d   : > { %228 = sbr.rel (%p1481_p1) target bundleno = 718 (0x2ce), region = 44 }
  0x52   : > { %v240_v1 = vlaneseq  ;;  %v686_v2 = vld [vmem:[#allocation8 + $0x78] sm:$0xff]  ;;  %v2009_v3 = vmov 1966171168   ;;  %v685_v5 = vld [vmem:[#allocation8 + $0x70] sm:$0xff]  ;;  %v684_v8 = vld [vmem:[#allocation8 + $0x68] sm:$0xff]  ;;  %vm638_vm1 = vcmask 523264  }
  0x53   : > { %v238_v4 = vunpack.c.l.s4 %v2009_v3  ;;  %1539 = vmatprep.subr.mxu0 %v686_v2  ;;  %1619 = vmatprep.subr.mxu1 %v686_v2  ;;  %v2188_v6 = vld [vmem:[%s2156_s24] sm:$0xff]  ;;  %v2191_v9 = vld [vmem:[%s2156_s24 + $0x8] sm:$0xff]  ;;  %vm1034_vm2 = vcmask 7168  }
  0x54   : > { %v241_v7 = vshrl.u32 %v240_v1, 7  ;;  %1540 = vmatpush3.msra.mxu0 %v686_v2  ;;  %1635 = vmatpush3.msra.mxu1 %v686_v2  ;;  %v236_v11 = vcombine.high %v2188_v6, %v2188_v6  ;;  %v285_v12 = vcombine.high %v2191_v9, %v2191_v9  ;;  %v683_v13 = vld [vmem:[#allocation8 + $0x60] sm:$0xff]  ;;  %v682_v19 = vld [vmem:[#allocation8 + $0x58] sm:$0xff]  ;;  %v681_v30 = vld [vmem:[#allocation8 + $0x50] sm:$0xff] }
  0x55   : > { %v239_v10 = vunpack.c.0.s8 %v238_v4  ;;  %1541 = vmatprep.subr.mxu0 %v685_v5  ;;  %1620 = vmatprep.subr.mxu1 %v685_v5  ;;  %v680_v51 = vld [vmem:[#allocation8 + $0x48] sm:$0xff] }
  0x56   : > { %1542 = vmatpush3.msra.mxu0 %v685_v5  ;;  %1636 = vmatpush3.msra.mxu1 %v685_v5  ;;  %v2203_v17 = vsub.s32 0, %v241_v7 }
  0x57   : > { %v2197_v14 = vsub.s32 %v239_v10, %v241_v7  ;;  %1543 = vmatprep.subr.mxu0 %v684_v8  ;;  %1621 = vmatprep.subr.mxu1 %v684_v8 }
  0x58   : > { %1544 = vmatpush3.msra.mxu0 %v684_v8  ;;  %1637 = vmatpush3.msra.mxu1 %v684_v8 }
  0x59   : > { %v243_v15 = vrot.slane %v2188_v6, %v2197_v14  ;;  %v292_v16 = vrot.slane %v2191_v9, %v2197_v14  ;;  %v2206_v18 = vrot.slane %v236_v11, %v2197_v14  ;;  %1545 = vmatprep.subr.mxu0 %v683_v13  ;;  %v2209_v20 = vrot.slane %v285_v12, %v2197_v14 }
  0x5a   : > { %1622 = vmatprep.subr.mxu1 %v683_v13  ;;  %1546 = vmatpush3.msra.mxu0 %v683_v13 }
  0x5b   : > { %v259_v21 = vrot.slane %v243_v15, %v2197_v14  ;;  %v308_v22 = vrot.slane %v292_v16, %v2197_v14  ;;  %v251_v23 = vcombine.high %v243_v15, %v243_v15  ;;  %v300_v24 = vcombine.high %v292_v16, %v292_v16  ;;  %1638 = vmatpush3.msra.mxu1 %v683_v13 }
  0x5c   : > { %v2215_v25 = vrot.slane %v2206_v18, %v2197_v14  ;;  %1547 = vmatprep.subr.mxu0 %v682_v19  ;;  %1623 = vmatprep.subr.mxu1 %v682_v19  ;;  %v2227_v33 = vrot.slane %v2209_v20, %v2197_v14  ;;  %v252_v34 = vcombine.high %v2206_v18, %v2206_v18 }
  0x5d   : > { %v330_v26 = vcombine.high %v308_v22, %v308_v22  ;;  %v2218_v27 = vrot.slane %v259_v21, %v2203_v17  ;;  %v2221_v28 = vrot.slane %v308_v22, %v2203_v17  ;;  %v281_v29 = vcombine.high %v259_v21, %v259_v21  ;;  %1548 = vmatpush3.msra.mxu0 %v682_v19 }
  0x5e   : > { %v273_v31 = vrot.slane %v251_v23, %v2197_v14  ;;  %v322_v32 = vrot.slane %v300_v24, %v2197_v14  ;;  %1639 = vmatpush3.msra.mxu1 %v682_v19  ;;  %1549 = vmatprep.subr.mxu0 %v681_v30  ;;  %v301_v46 = vcombine.high %v2209_v20, %v2209_v20 }
  0x5f   : > { %v478_v35 = vmul.f32 %v2218_v27, %v2188_v6  ;;  %v494_v36 = vmul.f32 %v2221_v28, %v2188_v6  ;;  %v479_v37 = vmul.f32 %v2218_v27, %v2191_v9  ;;  %v495_v38 = vmul.f32 %v2221_v28, %v2191_v9  ;;  %1624 = vmatprep.subr.mxu1 %v681_v30 }
  0x60   : > { %v332_v39 = vcombine.high %v322_v32, %v322_v32  ;;  %v2240_v40 = vrot.slane %v273_v31, %v2203_v17  ;;  %v2243_v41 = vrot.slane %v322_v32, %v2203_v17  ;;  %v283_v42 = vcombine.high %v273_v31, %v273_v31  ;;  %1550 = vmatpush3.msra.mxu0 %v681_v30 }
  0x61   : > { %v1748_v43 = vpack.i.bf16 %v494_v36, %v478_v35  ;;  %v2246_v44 = vrot.slane %v281_v29, %v2203_v17  ;;  %v2249_v45 = vrot.slane %v330_v26, %v2203_v17  ;;  %v1753_v52 = vpack.i.bf16 %v495_v38, %v479_v37  ;;  %1640 = vmatpush3.msra.mxu1 %v681_v30  ;;  %v678_v29 = vld [vmem:[#allocation8 + $0x38] sm:$0xff]  ;;  %v677_v37 = vld [vmem:[#allocation8 + $0x30] sm:$0xff] }
  0x62   : > { %v480_v47 = vmul.f32 %v2240_v40, %v2188_v6  ;;  %v496_v48 = vmul.f32 %v2243_v41, %v2188_v6  ;;  %v481_v49 = vmul.f32 %v2240_v40, %v2191_v9  ;;  %v497_v50 = vmul.f32 %v2243_v41, %v2191_v9  ;;  %1551 = vmatprep.subr.mxu0 %v680_v51 }
  0x63   : > { %1749 = vrot.lane.b32.xlu0 %v1748_v43, %s2010_s19  ;;  %v482_v53 = vmul.f32 %v2246_v44, %v2188_v6  ;;  %v498_v54 = vmul.f32 %v2249_v45, %v2188_v6  ;;  %v2268_v55 = vrot.slane %v2215_v25, %v2203_v17  ;;  %v2271_v57 = vrot.slane %v283_v42, %v2203_v17 }
  0x64   : > { %v1758_v56 = vpack.i.bf16 %v496_v48, %v480_v47  ;;  %v2274_v58 = vrot.slane %v332_v39, %v2203_v17  ;;  %v2278_v59 = vrot.slane %v2227_v33, %v2203_v17  ;;  %v1763_v60 = vpack.i.bf16 %v497_v50, %v481_v49  ;;  %1625 = vmatprep.subr.mxu1 %v680_v51  ;;  %v676_v50 = vld [vmem:[#allocation8 + $0x28] sm:$0xff] }
  0x65   : > { %v1768_v61 = vpack.i.bf16 %v498_v54, %v482_v53  ;;  %v483_v62 = vmul.f32 %v2246_v44, %v2191_v9  ;;  %v499_v63 = vmul.f32 %v2249_v45, %v2191_v9  ;;  %v484_v0 = vmul.f32 %v2271_v57, %v2188_v6  ;;  %1552 = vmatpush3.msra.mxu0 %v680_v51 }
  0x66   : > { %1759 = vrot.lane.b32.xlu1 %v1758_v56, %s2010_s19  ;;  %v500_v1 = vmul.f32 %v2274_v58, %v2188_v6  ;;  %v486_v2 = vmul.f32 %v2268_v55, %v2188_v6  ;;  %v280_v3 = vrot.slane %v252_v34, %v2197_v14  ;;  %v485_v4 = vmul.f32 %v2271_v57, %v2191_v9 }
  0x67   : > { %1754 = vrot.lane.b32.xlu0 %v1753_v52, %s2010_s19  ;;  %v502_v5 = vmul.f32 %v2278_v59, %v2188_v6  ;;  %v329_v7 = vrot.slane %v301_v46, %v2197_v14  ;;  %v282_v8 = vcombine.high %v2215_v25, %v2215_v25  ;;  %v501_v10 = vmul.f32 %v2274_v58, %v2191_v9  ;;  %v679_v14 = vld [vmem:[#allocation8 + $0x40] sm:$0xff] }
  0x68   : > { %v2304_v11 = vmul.f32 %v2268_v55, %v2191_v9  ;;  %v2308_v12 = vmul.f32 %v2278_v59, %v2191_v9  ;;  %v331_v13 = vcombine.high %v2227_v33, %v2227_v33  ;;  %v1773_v15 = vpack.i.bf16 %v499_v63, %v483_v62  ;;  %1641 = vmatpush3.msra.mxu1 %v680_v51  ;;  %v675_v63 = vld [vmem:[#allocation8 + $0x20] sm:$0xff] }
  0x69   : > { %v2314_v16 = vrot.slane %v280_v3, %v2203_v17  ;;  %v2317_v18 = vrot.slane %v329_v7, %v2203_v17  ;;  %v1778_v19 = vpack.i.bf16 %v500_v1, %v484_v0  ;;  %v2321_v20 = vrot.slane %v282_v8, %v2203_v17  ;;  %1553 = vmatprep.subr.mxu0 %v679_v14  ;;  %v674_v8 = vld [vmem:[#allocation8 + $0x18] sm:$0xff] }
  0x6a   : > { %1764 = vrot.lane.b32.xlu1 %v1763_v60, %s2010_s19  ;;  %v284_v21 = vcombine.high %v280_v3, %v280_v3  ;;  %v1783_v22 = vpack.i.bf16 %v502_v5, %v486_v2  ;;  %v1788_v23 = vpack.i.bf16 %v501_v10, %v485_v4  ;;  %v1793_v24 = vpack.i.bf16 %v2308_v12, %v2304_v11 }
  0x6b   : > { %1769 = vrot.lane.b32.xlu0 %v1768_v61, %s2010_s19  ;;  %v2326_v25 = vrot.slane %v331_v13, %v2203_v17  ;;  %v333_v26 = vcombine.high %v329_v7, %v329_v7  ;;  %1626 = vmatprep.subr.mxu1 %v679_v14  ;;  %v488_v30 = vmul.f32 %v2314_v16, %v2188_v6 }
  0x6c   : > { %v504_v31 = vmul.f32 %v2317_v18, %v2188_v6  ;;  %v489_v32 = vmul.f32 %v2314_v16, %v2191_v9  ;;  %1554 = vmatpush3.msra.mxu0 %v679_v14  ;;  %v505_v33 = vmul.f32 %v2317_v18, %v2191_v9  ;;  %v2340_v34 = vmul.f32 %v2321_v20, %v2188_v6 }
  0x6d   : > { %v2344_v35 = vmul.f32 %v2321_v20, %v2191_v9  ;;  %v2347_v36 = vrot.slane %v284_v21, %v2203_v17  ;;  %1642 = vmatpush3.msra.mxu1 %v679_v14  ;;  %1555 = vmatprep.subr.mxu0 %v678_v29  ;;  %v414_v38 = vsub.f32 %v2218_v27, %v2188_v6 }
  0x6e   : > { %1774 = vrot.lane.b32.xlu1 %v1773_v15, %s2010_s19  ;;  %v430_v39 = vsub.f32 %v2221_v28, %v2188_v6  ;;  %v415_v42 = vsub.f32 %v2218_v27, %v2191_v9  ;;  %v506_v43 = vmul.f32 %v2326_v25, %v2188_v6  ;;  %v2359_v46 = vmul.f32 %v2326_v25, %v2191_v9 }
  0x6f   : > { %1779 = vrot.lane.b32.xlu0 %v1778_v19, %s2010_s19  ;;  %1627 = vmatprep.subr.mxu1 %v678_v29  ;;  %v431_v47 = vsub.f32 %v2221_v28, %v2191_v9  ;;  %v1798_v48 = vpack.i.bf16 %v504_v31, %v488_v30  ;;  %v2365_v49 = vrot.slane %v333_v26, %v2203_v17 }
  0x70   : > { %1556 = vmatpush3.msra.mxu0 %v678_v29  ;;  %1643 = vmatpush3.msra.mxu1 %v678_v29  ;;  %v416_v51 = vsub.f32 %v2240_v40, %v2188_v6  ;;  %v432_v52 = vsub.f32 %v2243_v41, %v2188_v6  ;;  %v417_v53 = vsub.f32 %v2240_v40, %v2191_v9 }
  0x71   : > { %1557 = vmatprep.subr.mxu0 %v677_v37  ;;  %v433_v54 = vsub.f32 %v2243_v41, %v2191_v9  ;;  %1628 = vmatprep.subr.mxu1 %v677_v37  ;;  %v418_v17 = vsub.f32 %v2246_v44, %v2188_v6  ;;  %v434_v56 = vsub.f32 %v2249_v45, %v2188_v6 }
  0x72   : > { %1789 = vrot.lane.b32.xlu1 %v1788_v23, %s2010_s19  ;;  %1558 = vmatpush3.msra.mxu0 %v677_v37  ;;  %v419_v60 = vsub.f32 %v2246_v44, %v2191_v9  ;;  %v1803_v61 = vpack.i.bf16 %v505_v33, %v489_v32  ;;  %v492_v62 = vmul.f32 %v2347_v36, %v2188_v6  ;;  %v672_v33 = vld [vmem:[#allocation8 + $0x8] sm:$0xff]  ;;  %v449_v27 = vand.u32 2147483647, %v417_v53 }
  0x73   : > { %1784 = vrot.lane.b32.xlu0 %v1783_v22, %s2010_s19  ;;  %1644 = vmatpush3.msra.mxu1 %v677_v37  ;;  %v435_v0 = vsub.f32 %v2249_v45, %v2191_v9  ;;  %v1808_v1 = vpack.i.bf16 %v506_v43, %v2340_v34  ;;  %v508_v2 = vmul.f32 %v2365_v49, %v2188_v6  ;;  %v673_v22 = vld [vmem:[#allocation8 + $0x10] sm:$0xff]  ;;  %v465_v28 = vand.u32 2147483647, %v433_v54 }
  0x74   : > { %1559 = vmatprep.subr.mxu0 %v676_v50  ;;  %1629 = vmatprep.subr.mxu1 %v676_v50  ;;  %v420_v3 = vsub.f32 %v2271_v57, %v2188_v6  ;;  %v436_v4 = vsub.f32 %v2274_v58, %v2188_v6  ;;  %v421_v5 = vsub.f32 %v2271_v57, %v2191_v9 }
  0x75   : > { %1560 = vmatpush3.msra.mxu0 %v676_v50  ;;  %v437_v7 = vsub.f32 %v2274_v58, %v2191_v9  ;;  %1645 = vmatpush3.msra.mxu1 %v676_v50  ;;  %v422_v10 = vsub.f32 %v2268_v55, %v2188_v6  ;;  %v438_v11 = vsub.f32 %v2278_v59, %v2188_v6  ;;  %v671_v50 = vld [vmem:[#allocation8] sm:$0xff] }
  0x76   : > { %1794 = vrot.lane.b32.xlu1 %v1793_v24, %s2010_s19  ;;  %1561 = vmatprep.subr.mxu0 %v675_v63  ;;  %v423_v12 = vsub.f32 %v2268_v55, %v2191_v9  ;;  %v1813_v13 = vpack.i.bf16 %v2359_v46, %v2344_v35  ;;  %v493_v14 = vmul.f32 %v2347_v36, %v2191_v9 }
  0x77   : > { %1799 = vrot.lane.b32.xlu0 %v1798_v48, %s2010_s19  ;;  %1630 = vmatprep.subr.mxu1 %v675_v63  ;;  %v439_v15 = vsub.f32 %v2278_v59, %v2191_v9  ;;  %v1818_v19 = vpack.i.bf16 %v508_v2, %v492_v62  ;;  %v509_v21 = vmul.f32 %v2365_v49, %v2191_v9  ;;  %v462_v62 = vand.u32 2147483647, %v430_v39 }
  0x78   : > { %1562 = vmatpush3.msra.mxu0 %v675_v63  ;;  %1646 = vmatpush3.msra.mxu1 %v675_v63  ;;  %v424_v23 = vsub.f32 %v2314_v16, %v2188_v6  ;;  %v440_v24 = vsub.f32 %v2317_v18, %v2188_v6  ;;  %v425_v26 = vsub.f32 %v2314_v16, %v2191_v9  ;;  %v447_v39 = vand.u32 2147483647, %v415_v42 }
  0x79   : > { %1563 = vmatprep.subr.mxu0 %v674_v8  ;;  %v441_v29 = vsub.f32 %v2317_v18, %v2191_v9  ;;  %1631 = vmatprep.subr.mxu1 %v674_v8  ;;  %v426_v30 = vsub.f32 %v2321_v20, %v2188_v6  ;;  %v442_v31 = vsub.f32 %v2326_v25, %v2188_v6 }
  0x7a   : > { %1804 = vrot.lane.b32.xlu1 %v1803_v61, %s2010_s19  ;;  %1564 = vmatpush3.msra.mxu0 %v674_v8  ;;  %v427_v32 = vsub.f32 %v2321_v20, %v2191_v9  ;;  %v443_v34 = vsub.f32 %v2326_v25, %v2191_v9  ;;  %v1823_v35 = vpack.i.bf16 %v509_v21, %v493_v14  ;;  %v446_v61 = vand.u32 2147483647, %v414_v38 }
  0x7b   : > { %1809 = vrot.lane.b32.xlu0 %v1808_v1, %s2010_s19  ;;  %1647 = vmatpush3.msra.mxu1 %v674_v8  ;;  %v428_v37 = vsub.f32 %v2347_v36, %v2188_v6  ;;  %v444_v43 = vsub.f32 %v2365_v49, %v2188_v6  ;;  %v429_v46 = vsub.f32 %v2347_v36, %v2191_v9  ;;  %v448_v8 = vand.u32 2147483647, %v416_v51 }
  0x7c   : > { %1565 = vmatprep.subr.mxu0 %v673_v22  ;;  %1632 = vmatprep.subr.mxu1 %v673_v22  ;;  %v445_v48 = vsub.f32 %v2365_v49, %v2191_v9  ;;  %v463_v21 = vand.u32 2147483647, %v431_v47 }
  0x7d   : > { %1566 = vmatpush3.msra.mxu0 %v673_v22  ;;  %1648 = vmatpush3.msra.mxu1 %v673_v22 }
  0x7e   : > { %1814 = vrot.lane.b32.xlu1 %v1813_v13, %s2010_s19  ;;  %1567 = vmatprep.subr.mxu0 %v672_v33  ;;  %v464_v13 = vand.u32 2147483647, %v432_v52  ;;  %v477_v6 = vand.u32 2147483647, %v445_v48 }
  0x7f   : > { %1819 = vrot.lane.b32.xlu0 %v1818_v19, %s2010_s19  ;;  %1633 = vmatprep.subr.mxu1 %v672_v33 }
  0x80   : > { %1568 = vmatpush3.msra.mxu0 %v672_v33  ;;  %1649 = vmatpush3.msra.mxu1 %v672_v33 }
  0x81   : > { %1569 = vmatprep.subr.mxu0 %v671_v50  ;;  %1634 = vmatprep.subr.mxu1 %v671_v50 }
  0x82   : > { %1824 = vrot.lane.b32.xlu1 %v1823_v35, %s2010_s19  ;;  %1570 = vmatpush3.msra.mxu0 %v671_v50 }
  0x83   : > { %1650 = vmatpush3.msra.mxu1 %v671_v50 }
  0xd5   : > { %v1750_v63 = vpop.permute.xlu0 %1749 }
  0xd6   : > { %v1752_v1 = vunpack.i.h.bf16 %v1750_v63  ;;  %v1751_v2 = vunpack.i.l.bf16 %v1750_v63  ;;  %v450_v63 = vand.u32 2147483647, %v418_v17  ;;  %v451_v17 = vand.u32 2147483647, %v419_v60 }
  0xd8   : > { %v639_v14 = vsel %vm638_vm1, %v446_v61, %v1751_v2  ;;  %v655_v38 = vsel %vm638_vm1, %v462_v62, %v1752_v1  ;;  %v1760_v19 = vpop.permute.xlu1 %1759  ;;  %v466_v1 = vand.u32 2147483647, %v434_v56  ;;  %v467_v56 = vand.u32 2147483647, %v435_v0 }
  0xd9   : > { %v1755_v22 = vpop.permute.xlu0 %1754  ;;  %1571 = vmatprep.mubr.f32.mxu0 %v639_v14  ;;  %1595 = vmatprep.mubr.f32.mxu1 %v655_v38  ;;  %v1762_v51 = vunpack.i.h.bf16 %v1760_v19  ;;  %v1761_v33 = vunpack.i.l.bf16 %v1760_v19 }
  0xda   : > { %v1757_v35 = vunpack.i.h.bf16 %v1755_v22  ;;  %v1756_v52 = vunpack.i.l.bf16 %v1755_v22 }
  0xdb   : > { %v641_v50 = vsel %vm638_vm1, %v448_v8, %v1761_v33  ;;  %v657_v61 = vsel %vm638_vm1, %v464_v13, %v1762_v51 }
  0xdc   : > { %v640_v42 = vsel %vm638_vm1, %v447_v39, %v1756_v52  ;;  %v656_v47 = vsel %vm638_vm1, %v463_v21, %v1757_v35  ;;  %v1765_v62 = vpop.permute.xlu1 %1764  ;;  %v452_v39 = vand.u32 2147483647, %v420_v3  ;;  %v468_v21 = vand.u32 2147483647, %v436_v4 }
  0xdd   : > { %1572 = vmatmul.mubr.f32.vlgmr.msra.gmra.mxu0 %v640_v42  ;;  %1596 = vmatmul.mubr.f32.vlgmr.msra.gmra.mxu1 %v656_v47  ;;  %v1767_v40 = vunpack.i.h.bf16 %v1765_v62  ;;  %v1766_v53 = vunpack.i.l.bf16 %v1765_v62  ;;  %v1770_v2 = vpop.permute.xlu0 %1769  ;;  %v453_v3 = vand.u32 2147483647, %v421_v5  ;;  %v469_v4 = vand.u32 2147483647, %v437_v7 }
  0xde   : > { %1574 = vmatprep.mubr.f32.mxu0 %v641_v50  ;;  %1598 = vmatprep.mubr.f32.mxu1 %v657_v61  ;;  %v1772_v41 = vunpack.i.h.bf16 %v1770_v2  ;;  %v1771_v54 = vunpack.i.l.bf16 %v1770_v2  ;;  %v454_v61 = vand.u32 2147483647, %v422_v10  ;;  %v455_v10 = vand.u32 2147483647, %v423_v12 }
  0xdf   : > { %v642_v8 = vsel %vm638_vm1, %v449_v27, %v1766_v53  ;;  %v658_v13 = vsel %vm638_vm1, %v465_v28, %v1767_v40  ;;  %v470_v27 = vand.u32 2147483647, %v438_v11  ;;  %v471_v11 = vand.u32 2147483647, %v439_v15 }
  0xe0   : > { %v1775_v14 = vpop.permute.xlu1 %1774  ;;  %v643_v38 = vsel %vm638_vm1, %v450_v63, %v1771_v54  ;;  %v659_v19 = vsel %vm638_vm1, %v466_v1, %v1772_v41  ;;  %v456_v40 = vand.u32 2147483647, %v424_v23  ;;  %v472_v53 = vand.u32 2147483647, %v440_v24 }
  0xe1   : > { %1575 = vmatmul.mubr.f32.gmra.mxu0 %v642_v8  ;;  %1599 = vmatmul.mubr.f32.gmra.mxu1 %v658_v13  ;;  %v1777_v44 = vunpack.i.h.bf16 %v1775_v14  ;;  %v1776_v60 = vunpack.i.l.bf16 %v1775_v14  ;;  %v1780_v22 = vpop.permute.xlu0 %1779  ;;  %v457_v23 = vand.u32 2147483647, %v425_v26  ;;  %v473_v24 = vand.u32 2147483647, %v441_v29 }
  0xe2   : > { %1577 = vmatprep.mubr.f32.mxu0 %v643_v38  ;;  %1601 = vmatprep.mubr.f32.mxu1 %v659_v19  ;;  %v1782_v45 = vunpack.i.h.bf16 %v1780_v22  ;;  %v1781_v0 = vunpack.i.l.bf16 %v1780_v22  ;;  %v474_v14 = vand.u32 2147483647, %v442_v31  ;;  %v475_v31 = vand.u32 2147483647, %v443_v34 }
  0xe3   : > { %v644_v51 = vsel %vm638_vm1, %v451_v17, %v1776_v60  ;;  %v660_v33 = vsel %vm638_vm1, %v467_v56, %v1777_v44  ;;  %v458_v56 = vand.u32 2147483647, %v426_v30  ;;  %v459_v30 = vand.u32 2147483647, %v427_v32 }
  0xe4   : > { %v1790_v35 = vpop.permute.xlu1 %1789  ;;  %v645_v52 = vsel %vm638_vm1, %v452_v39, %v1781_v0  ;;  %v661_v50 = vsel %vm638_vm1, %v468_v21, %v1782_v45  ;;  %v460_v22 = vand.u32 2147483647, %v428_v37  ;;  %v476_v45 = vand.u32 2147483647, %v444_v43 }
  0xe5   : > { %1578 = vmatmul.mubr.f32.gmra.mxu0 %v644_v51  ;;  %1602 = vmatmul.mubr.f32.gmra.mxu1 %v660_v33  ;;  %v1792_v57 = vunpack.i.h.bf16 %v1790_v35  ;;  %v1791_v5 = vunpack.i.l.bf16 %v1790_v35  ;;  %v1785_v28 = vpop.permute.xlu0 %1784  ;;  %v461_v37 = vand.u32 2147483647, %v429_v46 }
  0xe6   : > { %1580 = vmatprep.mubr.f32.mxu0 %v645_v52  ;;  %1604 = vmatprep.mubr.f32.mxu1 %v661_v50  ;;  %v1787_v58 = vunpack.i.h.bf16 %v1785_v28  ;;  %v1786_v7 = vunpack.i.l.bf16 %v1785_v28 }
  0xe7   : > { %v646_v42 = vsel %vm638_vm1, %v453_v3, %v1791_v5  ;;  %v662_v47 = vsel %vm638_vm1, %v469_v4, %v1792_v57 }
  0xe8   : > { %v1795_v62 = vpop.permute.xlu1 %1794  ;;  %v647_v63 = vsel %vm638_vm1, %v454_v61, %v1786_v7  ;;  %v663_v1 = vsel %vm638_vm1, %v470_v27, %v1787_v58 }
  0xe9   : > { %1581 = vmatmul.mubr.f32.gmra.mxu0 %v646_v42  ;;  %1605 = vmatmul.mubr.f32.gmra.mxu1 %v662_v47  ;;  %v1797_v55 = vunpack.i.h.bf16 %v1795_v62  ;;  %v1796_v12 = vunpack.i.l.bf16 %v1795_v62  ;;  %v1800_v2 = vpop.permute.xlu0 %1799 }
  0xea   : > { %1583 = vmatprep.mubr.f32.mxu0 %v647_v63  ;;  %1607 = vmatprep.mubr.f32.mxu1 %v663_v1  ;;  %v1802_v59 = vunpack.i.h.bf16 %v1800_v2  ;;  %v1801_v15 = vunpack.i.l.bf16 %v1800_v2 }
  0xeb   : > { %v648_v41 = vsel %vm638_vm1, %v455_v10, %v1796_v12  ;;  %v664_v54 = vsel %vm638_vm1, %v471_v11, %v1797_v55 }
  0xec   : > { %v1805_v8 = vpop.permute.xlu1 %1804  ;;  %v649_v13 = vsel %vm638_vm1, %v456_v40, %v1801_v15  ;;  %v665_v17 = vsel %vm638_vm1, %v472_v53, %v1802_v59 }
  0xed   : > { %1584 = vmatmul.mubr.f32.gmra.mxu0 %v648_v41  ;;  %1608 = vmatmul.mubr.f32.gmra.mxu1 %v664_v54  ;;  %v1807_v16 = vunpack.i.h.bf16 %v1805_v8  ;;  %v1806_v26 = vunpack.i.l.bf16 %v1805_v8  ;;  %v1810_v38 = vpop.permute.xlu0 %1809 }
  0xee   : > { %1586 = vmatprep.mubr.f32.mxu0 %v649_v13  ;;  %1610 = vmatprep.mubr.f32.mxu1 %v665_v17  ;;  %v1812_v18 = vunpack.i.h.bf16 %v1810_v38  ;;  %v1811_v29 = vunpack.i.l.bf16 %v1810_v38 }
  0xef   : > { %v650_v19 = vsel %vm638_vm1, %v457_v23, %v1806_v26  ;;  %v666_v39 = vsel %vm638_vm1, %v473_v24, %v1807_v16 }
  0xf0   : > { %v1815_v21 = vpop.permute.xlu1 %1814  ;;  %v651_v44 = vsel %vm638_vm1, %v458_v56, %v1811_v29  ;;  %v667_v60 = vsel %vm638_vm1, %v474_v14, %v1812_v18 }
  0xf1   : > { %1587 = vmatmul.mubr.f32.gmra.mxu0 %v650_v19  ;;  %1611 = vmatmul.mubr.f32.gmra.mxu1 %v666_v39  ;;  %v1817_v20 = vunpack.i.h.bf16 %v1815_v21  ;;  %v1816_v32 = vunpack.i.l.bf16 %v1815_v21  ;;  %v1820_v0 = vpop.permute.xlu0 %1819 }
  0xf2   : > { %1589 = vmatprep.mubr.f32.mxu0 %v651_v44  ;;  %1613 = vmatprep.mubr.f32.mxu1 %v667_v60  ;;  %v1822_v25 = vunpack.i.h.bf16 %v1820_v0  ;;  %v1821_v34 = vunpack.i.l.bf16 %v1820_v0 }
  0xf3   : > { %v652_v51 = vsel %vm638_vm1, %v459_v30, %v1816_v32  ;;  %v668_v33 = vsel %vm638_vm1, %v475_v31, %v1817_v20 }
  0xf4   : > { %v1825_v43 = vpop.permute.xlu1 %1824  ;;  %v653_v3 = vsel %vm638_vm1, %v460_v22, %v1821_v34  ;;  %v669_v4 = vsel %vm638_vm1, %v476_v45, %v1822_v25 }
  0xf5   : > { %1590 = vmatmul.mubr.f32.gmra.mxu0 %v652_v51  ;;  %1614 = vmatmul.mubr.f32.gmra.mxu1 %v668_v33  ;;  %v1827_v35 = vunpack.i.h.bf16 %v1825_v43  ;;  %v1826_v52 = vunpack.i.l.bf16 %v1825_v43 }
  0xf6   : > { %1592 = vmatprep.mubr.f32.mxu0 %v653_v3  ;;  %1616 = vmatprep.mubr.f32.mxu1 %v669_v4 }
  0xf7   : > { %v654_v50 = vsel %vm638_vm1, %v461_v37, %v1826_v52  ;;  %v670_v36 = vsel %vm638_vm1, %v477_v6, %v1827_v35 }
  0xf9   : > { %1593 = vmatmul.mubr.f32.gmra.mxu0 %v654_v50  ;;  %1617 = vmatmul.mubr.f32.gmra.mxu1 %v670_v36 }
 0x19d   : > { %v1573_v46 = vpop.f32.mrf.mxu0  ;;  %v1597_v9 = vpop.f32.mrf.mxu1 }
 0x19f   : > { %v753_v49 = vpop.f32.mrf.mxu0  ;;  %v833_v48 = vpop.f32.mrf.mxu1 }
 0x1a0   : > { %944 = vxpose.xlu1.b32.start [1/16] (narrow) %v833_v48, 64  ;;  %912 = vxpose.xlu0.b32.start [1/16] (narrow) %v753_v49, 64 }
 0x1a1   : > { %v1576_v61 = vpop.f32.mrf.mxu0  ;;  %v1600_v27 = vpop.f32.mrf.mxu1 }
 0x1a3   : > { %v763_v57 = vpop.f32.mrf.mxu0  ;;  %v843_v5 = vpop.f32.mrf.mxu1 }
 0x1a4   : > { %945 = vxpose.xlu1.b32.cont [2/16] (narrow) %v1597_v9, 64  ;;  %913 = vxpose.xlu0.b32.cont [2/16] (narrow) %v1573_v46, 64 }
 0x1a5   : > { %v1579_v28 = vpop.f32.mrf.mxu0  ;;  %v1603_v58 = vpop.f32.mrf.mxu1 }
 0x1a7   : > { %v773_v7 = vpop.f32.mrf.mxu0  ;;  %v853_v42 = vpop.f32.mrf.mxu1 }
 0x1a8   : > { %946 = vxpose.xlu1.b32.cont [3/16] (narrow) %v843_v5, 64  ;;  %914 = vxpose.xlu0.b32.cont [3/16] (narrow) %v763_v57, 64 }
 0x1a9   : > { %v1582_v47 = vpop.f32.mrf.mxu0  ;;  %v1606_v10 = vpop.f32.mrf.mxu1 }
 0x1ab   : > { %v783_v11 = vpop.f32.mrf.mxu0  ;;  %v863_v62 = vpop.f32.mrf.mxu1 }
 0x1ac   : > { %947 = vxpose.xlu1.b32.cont [4/16] (narrow) %v1600_v27, 64  ;;  %915 = vxpose.xlu0.b32.cont [4/16] (narrow) %v1576_v61, 64 }
 0x1ad   : > { %v1585_v63 = vpop.f32.mrf.mxu0  ;;  %v1609_v1 = vpop.f32.mrf.mxu1 }
 0x1af   : > { %v793_v40 = vpop.f32.mrf.mxu0  ;;  %v873_v53 = vpop.f32.mrf.mxu1 }
 0x1b0   : > { %948 = vxpose.xlu1.b32.cont [5/16] (narrow) %v853_v42, 64  ;;  %916 = vxpose.xlu0.b32.cont [5/16] (narrow) %v773_v7, 64 }
 0x1b1   : > { %v1588_v55 = vpop.f32.mrf.mxu0  ;;  %v1612_v12 = vpop.f32.mrf.mxu1 }
 0x1b3   : > { %v803_v2 = vpop.f32.mrf.mxu0  ;;  %v883_v59 = vpop.f32.mrf.mxu1 }
 0x1b4   : > { %949 = vxpose.xlu1.b32.cont [6/16] (narrow) %v1603_v58, 64  ;;  %917 = vxpose.xlu0.b32.cont [6/16] (narrow) %v1579_v28, 64 }
 0x1b5   : > { %v1591_v15 = vpop.f32.mrf.mxu0  ;;  %v1615_v41 = vpop.f32.mrf.mxu1 }
 0x1b7   : > { %v813_v54 = vpop.f32.mrf.mxu0  ;;  %v893_v23 = vpop.f32.mrf.mxu1 }
 0x1b8   : > { %950 = vxpose.xlu1.b32.cont [7/16] (narrow) %v863_v62, 64  ;;  %918 = vxpose.xlu0.b32.cont [7/16] (narrow) %v783_v11, 64 }
 0x1b9   : > { %v1594_v24 = vpop.f32.mrf.mxu0  ;;  %v1618_v8 = vpop.f32.mrf.mxu1 }
 0x1bb   : > { %v823_v13 = vpop.f32.mrf.mxu0  ;;  %v903_v17 = vpop.f32.mrf.mxu1 }
 0x1bc   : > { %951 = vxpose.xlu1.b32.cont [8/16] (narrow) %v1606_v10, 64  ;;  %919 = vxpose.xlu0.b32.cont [8/16] (narrow) %v1582_v47, 64 }
 0x1c0   : > { %952 = vxpose.xlu1.b32.cont [9/16] (narrow) %v873_v53, 64  ;;  %920 = vxpose.xlu0.b32.cont [9/16] (narrow) %v793_v40, 64  ;;  %v1043_v40 = vld [vmem:[#allocation3] sm:$0xff] }
 0x1c4   : > { %953 = vxpose.xlu1.b32.cont [10/16] (narrow) %v1609_v1, 64  ;;  %921 = vxpose.xlu0.b32.cont [10/16] (narrow) %v1585_v63, 64  ;;  %v994_v63 = vld [vmem:[#allocation2] sm:$0xff] }
 0x1c8   : > { %954 = vxpose.xlu1.b32.cont [11/16] (narrow) %v883_v59, 64  ;;  %922 = vxpose.xlu0.b32.cont [11/16] (narrow) %v803_v2, 64  ;;  %v995_v2 = vld [vmem:[#allocation2 + $0x8] sm:$0xff] }
 0x1c9   : > { %v1044_v59 = vld [vmem:[#allocation3 + $0x8] sm:$0xff] }
 0x1cc   : > { %955 = vxpose.xlu1.b32.cont [12/16] (narrow) %v1612_v12, 64  ;;  %923 = vxpose.xlu0.b32.cont [12/16] (narrow) %v1588_v55, 64 }
 0x1d0   : > { %956 = vxpose.xlu1.b32.cont [13/16] (narrow) %v893_v23, 64  ;;  %924 = vxpose.xlu0.b32.cont [13/16] (narrow) %v813_v54, 64 }
 0x1d4   : > { %957 = vxpose.xlu1.b32.cont [14/16] (narrow) %v1615_v41, 64  ;;  %925 = vxpose.xlu0.b32.cont [14/16] (narrow) %v1591_v15, 64 }
 0x1d8   : > { %958 = vxpose.xlu1.b32.cont [15/16] (narrow) %v903_v17, 64  ;;  %926 = vxpose.xlu0.b32.cont [15/16] (narrow) %v823_v13, 64 }
 0x1dc   : > { %959 = vxpose.xlu1.b32.end [16/16] (narrow) %v1618_v8, 64  ;;  %927 = vxpose.xlu0.b32.end [16/16] (narrow) %v1594_v24, 64  ;;  %v996_v24 = vld [vmem:[#allocation2 + $0x10] sm:$0xff] }
 0x1dd   : > { %v1045_v8 = vld [vmem:[#allocation3 + $0x10] sm:$0xff] }
 0x21c   : > { %v960_v56 = vpop.trf.xlu1  ;;  %v928_v14 = vpop.trf.xlu0 }
 0x21d   : > { %979 = vst [vmem:[#allocation4] sm:$0xff] %v960_v56  ;;  %978 = vst [vmem:[#allocation4 + $0x30] sm:$0xff] %v928_v14  ;;  %v1002_v16 = vadd.f32 %v960_v56, %v928_v14  ;;  %v1051_v26 = vmul.f32 %v928_v14, %v928_v14  ;;  %v1052_v38 = vmul.f32 %v960_v56, %v960_v56 }
 0x21f   : > { %1003 = vadd.xlane.f32.xlu0 %v1002_v16  ;;  %v1067_v18 = vadd.f32 %v1052_v38, %v1051_v26  ;;  %v997_v16 = vld [vmem:[#allocation2 + $0x18] sm:$0xff]  ;;  %v998_v38 = vld [vmem:[#allocation2 + $0x20] sm:$0xff] }
 0x220   : > { %v961_v29 = vpop.trf.xlu1  ;;  %v929_v19 = vpop.trf.xlu0 }
 0x221   : > { %981 = vst [vmem:[#allocation4 + $0x18] sm:$0xff] %v961_v29  ;;  %980 = vst [vmem:[#allocation4 + $0x58] sm:$0xff] %v929_v19  ;;  %1068 = vadd.xlane.f32.xlu1 %v1067_v18  ;;  %v1053_v39 = vmul.f32 %v929_v19, %v929_v19  ;;  %v1054_v30 = vmul.f32 %v961_v29, %v961_v29  ;;  %v1005_v31 = vadd.f32 %v961_v29, %v929_v19  ;;  %v1046_v19 = vld [vmem:[#allocation3 + $0x18] sm:$0xff] }
 0x223   : > { %v1070_v21 = vadd.f32 %v1054_v30, %v1053_v39 }
 0x224   : > { %v962_v44 = vpop.trf.xlu1  ;;  %v930_v60 = vpop.trf.xlu0 }
 0x225   : > { %983 = vst [vmem:[#allocation4 + $0x68] sm:$0xff] %v962_v44  ;;  %982 = vst [vmem:[#allocation4 + $0x50] sm:$0xff] %v930_v60  ;;  %1006 = vadd.xlane.f32.xlu1 %v1005_v31  ;;  %1071 = vadd.xlane.f32.xlu0 %v1070_v21  ;;  %v1008_v22 = vadd.f32 %v962_v44, %v930_v60  ;;  %v1055_v45 = vmul.f32 %v930_v60, %v930_v60  ;;  %v1047_v31 = vld [vmem:[#allocation3 + $0x20] sm:$0xff]  ;;  %v999_v60 = vld [vmem:[#allocation2 + $0x28] sm:$0xff] }
 0x226   : > { %v1056_v20 = vmul.f32 %v962_v44, %v962_v44 }
 0x228   : > { %v1073_v32 = vadd.f32 %v1056_v20, %v1055_v45  ;;  %v963_v0 = vpop.trf.xlu1  ;;  %v931_v25 = vpop.trf.xlu0  ;;  %v1000_v20 = vld [vmem:[#allocation2 + $0x30] sm:$0xff] }
 0x229   : > { %985 = vst [vmem:[#allocation4 + $0x48] sm:$0xff] %v963_v0  ;;  %984 = vst [vmem:[#allocation4 + $0x8] sm:$0xff] %v931_v25  ;;  %1009 = vadd.xlane.f32.xlu0 %v1008_v22  ;;  %v1011_v34 = vadd.f32 %v963_v0, %v931_v25  ;;  %v1057_v51 = vmul.f32 %v931_v25, %v931_v25  ;;  %v1058_v33 = vmul.f32 %v963_v0, %v963_v0  ;;  %v1048_v25 = vld [vmem:[#allocation3 + $0x28] sm:$0xff] }
 0x22a   : > { %1074 = vadd.xlane.f32.xlu1 %v1073_v32 }
 0x22b   : > { %v1076_v35 = vadd.f32 %v1058_v33, %v1057_v51  ;;  %v1049_v33 = vld [vmem:[#allocation3 + $0x30] sm:$0xff] }
 0x22c   : > { %v964_v37 = vpop.trf.xlu1  ;;  %v932_v6 = vpop.trf.xlu0 }
 0x22d   : > { %987 = vst [vmem:[#allocation4 + $0x20] sm:$0xff] %v964_v37  ;;  %986 = vst [vmem:[#allocation4 + $0x40] sm:$0xff] %v932_v6  ;;  %1012 = vadd.xlane.f32.xlu0 %v1011_v34  ;;  %v1014_v43 = vadd.f32 %v964_v37, %v932_v6  ;;  %v1059_v3 = vmul.f32 %v932_v6, %v932_v6  ;;  %v1060_v4 = vmul.f32 %v964_v37, %v964_v37 }
 0x22f   : > { %1015 = vadd.xlane.f32.xlu1 %v1014_v43  ;;  %v1079_v52 = vadd.f32 %v1060_v4, %v1059_v3  ;;  %v1001_v43 = vld [vmem:[#allocation2 + $0x38] sm:$0xff] }
 0x230   : > { %v965_v50 = vpop.trf.xlu1  ;;  %v933_v36 = vpop.trf.xlu0 }
 0x231   : > { %989 = vst [vmem:[#allocation4 + $0x38] sm:$0xff] %v965_v50  ;;  %988 = vst [vmem:[#allocation4 + $0x10] sm:$0xff] %v933_v36  ;;  %1077 = vadd.xlane.f32.xlu0 %v1076_v35  ;;  %v1017_v46 = vadd.f32 %v965_v50, %v933_v36  ;;  %v1061_v9 = vmul.f32 %v933_v36, %v933_v36  ;;  %v1062_v49 = vmul.f32 %v965_v50, %v965_v50 }
 0x233   : > { %1080 = vadd.xlane.f32.xlu1 %v1079_v52  ;;  %v1082_v28 = vadd.f32 %v1062_v49, %v1061_v9  ;;  %v1050_v52 = vld [vmem:[#allocation3 + $0x38] sm:$0xff] }
 0x234   : > { %v966_v48 = vpop.trf.xlu1  ;;  %v934_v61 = vpop.trf.xlu0 }
 0x235   : > { %991 = vst [vmem:[#allocation4 + $0x70] sm:$0xff] %v966_v48  ;;  %990 = vst [vmem:[#allocation4 + $0x60] sm:$0xff] %v934_v61  ;;  %1018 = vadd.xlane.f32.xlu0 %v1017_v46  ;;  %v1020_v27 = vadd.f32 %v966_v48, %v934_v61  ;;  %v1063_v57 = vmul.f32 %v934_v61, %v934_v61  ;;  %v1064_v5 = vmul.f32 %v966_v48, %v966_v48 }
 0x237   : > { %1021 = vadd.xlane.f32.xlu1 %v1020_v27  ;;  %v1085_v58 = vadd.f32 %v1064_v5, %v1063_v57 }
 0x238   : > { %v967_v7 = vpop.trf.xlu1  ;;  %v935_v42 = vpop.trf.xlu0 }
 0x239   : > { %1083 = vadd.xlane.f32.xlu0 %v1082_v28  ;;  %993 = vst [vmem:[#allocation4 + $0x28] sm:$0xff] %v967_v7  ;;  %992 = vst [vmem:[#allocation4 + $0x78] sm:$0xff] %v935_v42  ;;  %v1023_v47 = vadd.f32 %v967_v7, %v935_v42  ;;  %v1065_v10 = vmul.f32 %v935_v42, %v935_v42  ;;  %v1066_v11 = vmul.f32 %v967_v7, %v967_v7 }
 0x23b   : > { %1086 = vadd.xlane.f32.xlu1 %v1085_v58  ;;  %v1088_v62 = vadd.f32 %v1066_v11, %v1065_v10 }
 0x23d   : > { %1024 = vadd.xlane.f32.xlu0 %v1023_v47 }
 0x241   : > { %1089 = vadd.xlane.f32.xlu0 %v1088_v62 }
 0x2a8   : > { %v1004_v1 = vpop.xlane.xlu0 %1003 }
 0x2a9   : > { %v1026_v53 = vadd.f32 %v1004_v1, %v994_v63 }
 0x2aa   : > { %v1069_v55 = vpop.xlane.xlu1 %1068 }
 0x2ab   : > { %1035 = vst.msk [vmem:[#allocation2] sm:$0xff] %vm1034_vm2, %v1026_v53  ;;  %v1091_v12 = vadd.f32 %v1069_v55, %v1043_v40 }
 0x2ad   : > { %1099 = vst.msk [vmem:[#allocation3] sm:$0xff] %vm1034_vm2, %v1091_v12 }
 0x2ae   : > { %v1007_v15 = vpop.xlane.xlu1 %1006  ;;  %v1072_v41 = vpop.xlane.xlu0 %1071 }
 0x2af   : > { %v1027_v54 = vadd.f32 %v1007_v15, %v995_v2  ;;  %v1092_v23 = vadd.f32 %v1072_v41, %v1044_v59 }
 0x2b1   : > { %1036 = vst.msk [vmem:[#allocation2 + $0x8] sm:$0xff] %vm1034_vm2, %v1027_v54  ;;  %1100 = vst.msk [vmem:[#allocation3 + $0x8] sm:$0xff] %vm1034_vm2, %v1092_v23 }
 0x2b2   : > { %v1010_v13 = vpop.xlane.xlu0 %1009 }
 0x2b3   : > { %v1075_v17 = vpop.xlane.xlu1 %1074  ;;  %v1028_v56 = vadd.f32 %v1010_v13, %v996_v24 }
 0x2b4   : > { %v1093_v14 = vadd.f32 %v1075_v17, %v1045_v8 }
 0x2b5   : > { %1037 = vst.msk [vmem:[#allocation2 + $0x10] sm:$0xff] %vm1034_vm2, %v1028_v56 }
 0x2b6   : > { %1101 = vst.msk [vmem:[#allocation3 + $0x10] sm:$0xff] %vm1034_vm2, %v1093_v14  ;;  %v1013_v26 = vpop.xlane.xlu0 %1012 }
 0x2b7   : > { %v1029_v18 = vadd.f32 %v1013_v26, %v997_v16 }
 0x2b8   : > { %v1016_v29 = vpop.xlane.xlu1 %1015 }
 0x2b9   : > { %1038 = vst.msk [vmem:[#allocation2 + $0x18] sm:$0xff] %vm1034_vm2, %v1029_v18  ;;  %v1030_v39 = vadd.f32 %v1016_v29, %v998_v38 }
 0x2ba   : > { %v1078_v30 = vpop.xlane.xlu0 %1077 }
 0x2bb   : > { %1039 = vst.msk [vmem:[#allocation2 + $0x20] sm:$0xff] %vm1034_vm2, %v1030_v39  ;;  %v1094_v21 = vadd.f32 %v1078_v30, %v1046_v19 }
 0x2bc   : > { %v1081_v44 = vpop.xlane.xlu1 %1080 }
 0x2bd   : > { %1102 = vst.msk [vmem:[#allocation3 + $0x18] sm:$0xff] %vm1034_vm2, %v1094_v21  ;;  %v1095_v22 = vadd.f32 %v1081_v44, %v1047_v31 }
 0x2be   : > { %v1019_v45 = vpop.xlane.xlu0 %1018 }
 0x2bf   : > { %1103 = vst.msk [vmem:[#allocation3 + $0x20] sm:$0xff] %vm1034_vm2, %v1095_v22  ;;  %v1031_v32 = vadd.f32 %v1019_v45, %v999_v60 }
 0x2c0   : > { %v1022_v0 = vpop.xlane.xlu1 %1021 }
 0x2c1   : > { %1040 = vst.msk [vmem:[#allocation2 + $0x28] sm:$0xff] %vm1034_vm2, %v1031_v32  ;;  %v1032_v34 = vadd.f32 %v1022_v0, %v1000_v20 }
 0x2c2   : > { %v1084_v51 = vpop.xlane.xlu0 %1083 }
 0x2c3   : > { %1041 = vst.msk [vmem:[#allocation2 + $0x30] sm:$0xff] %vm1034_vm2, %v1032_v34  ;;  %v1096_v37 = vadd.f32 %v1084_v51, %v1048_v25 }
 0x2c4   : > { %v1087_v6 = vpop.xlane.xlu1 %1086 }
 0x2c5   : > { %1104 = vst.msk [vmem:[#allocation3 + $0x28] sm:$0xff] %vm1034_vm2, %v1096_v37  ;;  %v1097_v3 = vadd.f32 %v1087_v6, %v1049_v33 }
 0x2c6   : > { %v1025_v4 = vpop.xlane.xlu0 %1024 }
 0x2c7   : > { %1105 = vst.msk [vmem:[#allocation3 + $0x30] sm:$0xff] %vm1034_vm2, %v1097_v3  ;;  %v1033_v35 = vadd.f32 %v1025_v4, %v1001_v43 }
 0x2c9   : > { %1042 = vst.msk [vmem:[#allocation2 + $0x38] sm:$0xff] %vm1034_vm2, %v1033_v35 }
 0x2ca   : > { %v1090_v50 = vpop.xlane.xlu0 %1089 }
 0x2cb   : > { %v1098_v36 = vadd.f32 %v1090_v50, %v1050_v52 }
 0x2cd   : > { %1106 = vst.msk [vmem:[#allocation3 + $0x38] sm:$0xff] %vm1034_vm2, %v1098_v36 }
 0x2ce PF: > { %p1482_p12 = scmp.ne.s32.totalorder %s1986_s12, 1 }
 0x2d0   : > { %1110 = sbr.rel (%p1482_p12) target bundleno = 893 (0x37d), region = 48 }
 0x2d5   : > { %v1131_v46 = vld [vmem:[#allocation2 + $0x10] sm:$0xff]  ;;  %v1129_v49 = vld [vmem:[#allocation2] sm:$0xff]  ;;  %v2011_v48 = vmov 0   ;;  %v1132_v28 = vld [vmem:[#allocation2 + $0x18] sm:$0xff] }
 0x2d6   : > { %v1147_v9 = vld [vmem:[#allocation3 + $0x10] sm:$0xff]  ;;  %1831 = vset.pattern.permute.xlu1 %v2011_v48  ;;  %1830 = vset.pattern.permute.xlu0 %v2011_v48  ;;  %v1139_v61 = vmul.f32 0.00390625, %v1131_v46  ;;  %v1137_v57 = vmul.f32 0.00390625, %v1129_v49  ;;  %v1145_v5 = vld [vmem:[#allocation3] sm:$0xff]  ;;  %v1148_v58 = vld [vmem:[#allocation3 + $0x18] sm:$0xff]  ;;  %v1140_v42 = vmul.f32 0.00390625, %v1132_v28 }
 0x2d7   : > { %v1155_v27 = vmul.f32 0.00390625, %v1147_v9  ;;  %v1153_v7 = vmul.f32 0.00390625, %v1145_v5  ;;  %v1156_v47 = vmul.f32 0.00390625, %v1148_v58  ;;  %v1130_v10 = vld [vmem:[#allocation2 + $0x8] sm:$0xff]  ;;  %v1133_v12 = vld [vmem:[#allocation2 + $0x20] sm:$0xff]  ;;  %v1136_v23 = vld [vmem:[#allocation2 + $0x38] sm:$0xff] }
 0x2d8   : > { %v1146_v11 = vld [vmem:[#allocation3 + $0x8] sm:$0xff]  ;;  %1213 = vperm.xlu1 %1831, %v1139_v61   ;;  %v1163_v63 = vmul.f32 %v1139_v61, %v1139_v61  ;;  %1203 = vperm.xlu0 %1830, %v1137_v57   ;;  %v1161_v1 = vmul.f32 %v1137_v57, %v1137_v57  ;;  %v1138_v40 = vmul.f32 0.00390625, %v1130_v10  ;;  %v1149_v2 = vld [vmem:[#allocation3 + $0x20] sm:$0xff]  ;;  %v1164_v59 = vmul.f32 %v1140_v42, %v1140_v42  ;;  %v1152_v24 = vld [vmem:[#allocation3 + $0x38] sm:$0xff] }
 0x2d9   : > { %v1134_v62 = vld [vmem:[#allocation2 + $0x28] sm:$0xff]  ;;  %v1154_v53 = vmul.f32 0.00390625, %v1146_v11  ;;  %v1141_v54 = vmul.f32 0.00390625, %v1133_v12  ;;  %v1157_v56 = vmul.f32 0.00390625, %v1149_v2  ;;  %v1144_v38 = vmul.f32 0.00390625, %v1136_v23  ;;  %v1135_v18 = vld [vmem:[#allocation2 + $0x30] sm:$0xff] }
 0x2da   : > { %v1150_v55 = vld [vmem:[#allocation3 + $0x28] sm:$0xff]  ;;  %v1142_v15 = vmul.f32 0.00390625, %v1134_v62  ;;  %v1171_v8 = vsub.f32 %v1155_v27, %v1163_v63  ;;  %v1169_v13 = vsub.f32 %v1153_v7, %v1161_v1  ;;  %v1162_v17 = vmul.f32 %v1138_v40, %v1138_v40  ;;  %v1151_v22 = vld [vmem:[#allocation3 + $0x30] sm:$0xff]  ;;  %v1114_v63 = vld [vmem:[#allocation4] sm:$0xff] }
 0x2db   : > { %v1158_v41 = vmul.f32 0.00390625, %v1150_v55  ;;  %v1172_v14 = vsub.f32 %v1156_v47, %v1164_v59  ;;  %v1165_v26 = vmul.f32 %v1141_v54, %v1141_v54  ;;  %v1160_v30 = vmul.f32 0.00390625, %v1152_v24  ;;  %v1113_v62 = vld [vmem:[#allocation4 + $0x30] sm:$0xff]  ;;  %v1118_v2 = vld [vmem:[#allocation4 + $0x68] sm:$0xff] }
 0x2dc   : > { %v1166_v16 = vmul.f32 %v1142_v15, %v1142_v15  ;;  %v1179_v29 = vmax.f32 %v1171_v8, 0.0  ;;  %v1177_v19 = vmax.f32 %v1169_v13, 0.0  ;;  %1218 = vperm.xlu1 %1831, %v1140_v42   ;;  %v1170_v39 = vsub.f32 %v1154_v53, %v1162_v17  ;;  %1208 = vperm.xlu0 %1830, %v1138_v40   ;;  %v1115_v40 = vld [vmem:[#allocation4 + $0x58] sm:$0xff]  ;;  %v1117_v12 = vld [vmem:[#allocation4 + $0x50] sm:$0xff]  ;;  %v1120_v23 = vld [vmem:[#allocation4 + $0x48] sm:$0xff] }
 0x2dd   : > { %v1180_v31 = vmax.f32 %v1172_v14, 0.0  ;;  %v1173_v44 = vsub.f32 %v1157_v56, %v1165_v26  ;;  %v1168_v60 = vmul.f32 %v1144_v38, %v1144_v38  ;;  %v1143_v0 = vmul.f32 0.00390625, %v1135_v18  ;;  %v1116_v53 = vld [vmem:[#allocation4 + $0x18] sm:$0xff]  ;;  %v1121_v26 = vld [vmem:[#allocation4 + $0x40] sm:$0xff] }
 0x2de   : > { %v1174_v21 = vsub.f32 %v1158_v41, %v1166_v16  ;;  %v1187_v45 = vadd.f32 1e-05, %v1179_v29  ;;  %v1185_v20 = vadd.f32 1e-05, %v1177_v19  ;;  %v1178_v32 = vmax.f32 %v1170_v39, 0.0 }
 0x2df   : > { %v1181_v25 = vmax.f32 %v1173_v44, 0.0  ;;  %v1159_v51 = vmul.f32 0.00390625, %v1151_v22  ;;  %v1167_v33 = vmul.f32 %v1143_v0, %v1143_v0  ;;  %v1188_v37 = vadd.f32 1e-05, %v1180_v31  ;;  %v1123_v44 = vld [vmem:[#allocation4 + $0x10] sm:$0xff] }
 0x2e0   : > { %v1186_v34 = vadd.f32 1e-05, %v1178_v32  ;;  %1228 = vperm.xlu1 %1831, %v1142_v15   ;;  %1223 = vperm.xlu0 %1830, %v1141_v54   ;;  %1832 = vrsqrt.f32 %v1185_v20  ;;  %v1182_v6 = vmax.f32 %v1174_v21, 0.0  ;;  %v1176_v43 = vsub.f32 %v1160_v30, %v1168_v60  ;;  %v1119_v54 = vld [vmem:[#allocation4 + $0x8] sm:$0xff]  ;;  %v1124_v60 = vld [vmem:[#allocation4 + $0x38] sm:$0xff] }
 0x2e1   : > { %1834 = vrsqrt.f32 %v1187_v45  ;;  %v1175_v3 = vsub.f32 %v1159_v51, %v1167_v33  ;;  %v1189_v4 = vadd.f32 1e-05, %v1181_v25  ;;  %v1125_v51 = vld [vmem:[#allocation4 + $0x60] sm:$0xff]  ;;  %v1126_v33 = vld [vmem:[#allocation4 + $0x70] sm:$0xff] }
 0x2e2   : > { %1836 = vrsqrt.f32 %v1186_v34  ;;  %v1190_v52 = vadd.f32 1e-05, %v1182_v6  ;;  %v1184_v50 = vmax.f32 %v1176_v43, 0.0 }
 0x2e3   : > { %v1183_v35 = vmax.f32 %v1175_v3, 0.0  ;;  %1838 = vrsqrt.f32 %v1188_v37 }
 0x2e4   : > { %1238 = vperm.xlu1 %1831, %v1144_v38   ;;  %1233 = vperm.xlu0 %1830, %v1143_v0   ;;  %1840 = vrsqrt.f32 %v1189_v4  ;;  %v1192_v46 = vadd.f32 1e-05, %v1184_v50  ;;  %v1122_v38 = vld [vmem:[#allocation4 + $0x20] sm:$0xff]  ;;  %v1127_v50 = vld [vmem:[#allocation4 + $0x78] sm:$0xff] }
 0x2e5   : > { %v1191_v36 = vadd.f32 1e-05, %v1183_v35  ;;  %1842 = vrsqrt.f32 %v1190_v52 }
 0x2e7   : > { %1844 = vrsqrt.f32 %v1191_v36  ;;  %v1128_v36 = vld [vmem:[#allocation4 + $0x28] sm:$0xff] }
 0x2e8   : > { %1846 = vrsqrt.f32 %v1192_v46 }
 0x2ed   : > { %v1833_v9 = vpop.eup %1832 }
 0x2ee   : > { %v1835_v49 = vpop.eup %1834  ;;  %1259 = vperm.xlu0 %1830, %v1833_v9  }
 0x2ef   : > { %v1837_v48 = vpop.eup %1836 }
 0x2f0   : > { %1264 = vperm.xlu1 %1831, %v1837_v48   ;;  %v1839_v61 = vpop.eup %1838 }
 0x2f1   : > { %v1841_v27 = vpop.eup %1840 }
 0x2f2   : > { %1269 = vperm.xlu0 %1830, %v1835_v49   ;;  %v1843_v57 = vpop.eup %1842 }
 0x2f4   : > { %1274 = vperm.xlu1 %1831, %v1839_v61   ;;  %v1845_v5 = vpop.eup %1844 }
 0x2f5   : > { %v1847_v28 = vpop.eup %1846 }
 0x2f6   : > { %1279 = vperm.xlu0 %1830, %v1841_v27  }
 0x2f8   : > { %1284 = vperm.xlu1 %1831, %v1843_v57  }
 0x2fa   : > { %1289 = vperm.xlu0 %1830, %v1845_v5  }
 0x2fc   : > { %1294 = vperm.xlu1 %1831, %v1847_v28  }
 0x353   : > { %v1204_v58 = vpop.permute.xlu0 %1203  ;;  %v1214_v7 = vpop.permute.xlu1 %1213 }
 0x354   : > { %v1241_v59 = vsub.f32 %v1113_v62, %v1204_v58  ;;  %v1242_v15 = vsub.f32 %v1114_v63, %v1204_v58  ;;  %v1245_v56 = vsub.f32 %v1117_v12, %v1214_v7  ;;  %v1246_v14 = vsub.f32 %v1118_v2, %v1214_v7 }
 0x357   : > { %v1209_v42 = vpop.permute.xlu0 %1208  ;;  %v1219_v47 = vpop.permute.xlu1 %1218 }
 0x358   : > { %v1243_v24 = vsub.f32 %v1115_v40, %v1209_v42  ;;  %v1244_v8 = vsub.f32 %v1116_v53, %v1209_v42  ;;  %v1247_v30 = vsub.f32 %v1119_v54, %v1219_v47  ;;  %v1248_v31 = vsub.f32 %v1120_v23, %v1219_v47 }
 0x35b   : > { %v1224_v10 = vpop.permute.xlu0 %1223  ;;  %v2587_v11 = vpop.permute.xlu1 %1228 }
 0x35c   : > { %v1249_v0 = vsub.f32 %v1121_v26, %v1224_v10  ;;  %v1250_v25 = vsub.f32 %v1122_v38, %v1224_v10  ;;  %v1251_v4 = vsub.f32 %v1123_v44, %v2587_v11  ;;  %v1252_v35 = vsub.f32 %v1124_v60, %v2587_v11 }
 0x35f   : > { %v2589_v1 = vpop.permute.xlu0 %1233  ;;  %v2591_v55 = vpop.permute.xlu1 %1238 }
 0x360   : > { %v1253_v61 = vsub.f32 %v1125_v51, %v2589_v1  ;;  %v1254_v27 = vsub.f32 %v1126_v33, %v2589_v1  ;;  %v1255_v42 = vsub.f32 %v1127_v50, %v2591_v55  ;;  %v1256_v47 = vsub.f32 %v1128_v36, %v2591_v55 }
 0x369   : > { %v1260_v41 = vpop.permute.xlu0 %1259 }
 0x36a   : > { %v1297_v13 = vmul.f32 %v1260_v41, %v1241_v59  ;;  %v1298_v17 = vmul.f32 %v1260_v41, %v1242_v15 }
 0x36b   : > { %v1265_v16 = vpop.permute.xlu1 %1264 }
 0x36c   : > { %v1299_v18 = vmul.f32 %v1265_v16, %v1243_v24  ;;  %v1300_v29 = vmul.f32 %v1265_v16, %v1244_v8  ;;  %v1313_v19 = vmax.f32 %v1297_v13, 0.0  ;;  %v1314_v39 = vmax.f32 %v1298_v17, 0.0 }
 0x36d   : > { %v1270_v21 = vpop.permute.xlu0 %1269 }
 0x36e   : > { %v1315_v22 = vmax.f32 %v1299_v18, 0.0  ;;  %v1316_v45 = vmax.f32 %v1300_v29, 0.0  ;;  %1329 = vst [vmem:[%s2168_s27] sm:$0xff] %v1313_v19  ;;  %1330 = vst [vmem:[%s2168_s27 + $0x8] sm:$0xff] %v1314_v39  ;;  %v1301_v20 = vmul.f32 %v1270_v21, %v1245_v56  ;;  %v1302_v32 = vmul.f32 %v1270_v21, %v1246_v14 }
 0x36f   : > { %v1275_v34 = vpop.permute.xlu1 %1274 }
 0x370   : > { %1331 = vst [vmem:[%s2168_s27 + $0x10] sm:$0xff] %v1315_v22  ;;  %1332 = vst [vmem:[%s2168_s27 + $0x18] sm:$0xff] %v1316_v45  ;;  %v1303_v37 = vmul.f32 %v1275_v34, %v1247_v30  ;;  %v1304_v6 = vmul.f32 %v1275_v34, %v1248_v31  ;;  %v1317_v43 = vmax.f32 %v1301_v20, 0.0  ;;  %v1318_v3 = vmax.f32 %v1302_v32, 0.0 }
 0x371   : > { %v1280_v52 = vpop.permute.xlu0 %1279 }
 0x372   : > { %v1319_v46 = vmax.f32 %v1303_v37, 0.0  ;;  %v1320_v9 = vmax.f32 %v1304_v6, 0.0  ;;  %1333 = vst [vmem:[%s2168_s27 + $0x20] sm:$0xff] %v1317_v43  ;;  %1334 = vst [vmem:[%s2168_s27 + $0x28] sm:$0xff] %v1318_v3  ;;  %v1305_v49 = vmul.f32 %v1280_v52, %v1249_v0  ;;  %v1306_v48 = vmul.f32 %v1280_v52, %v1250_v25 }
 0x373   : > { %v1285_v57 = vpop.permute.xlu1 %1284 }
 0x374   : > { %1335 = vst [vmem:[%s2168_s27 + $0x30] sm:$0xff] %v1319_v46  ;;  %1336 = vst [vmem:[%s2168_s27 + $0x38] sm:$0xff] %v1320_v9  ;;  %v1307_v5 = vmul.f32 %v1285_v57, %v1251_v4  ;;  %v1308_v28 = vmul.f32 %v1285_v57, %v1252_v35  ;;  %v1321_v58 = vmax.f32 %v1305_v49, 0.0  ;;  %v1322_v7 = vmax.f32 %v1306_v48, 0.0 }
 0x375   : > { %v1290_v10 = vpop.permute.xlu0 %1289 }
 0x376   : > { %v1323_v11 = vmax.f32 %v1307_v5, 0.0  ;;  %v1324_v62 = vmax.f32 %v1308_v28, 0.0  ;;  %1337 = vst [vmem:[%s2168_s27 + $0x40] sm:$0xff] %v1321_v58  ;;  %1338 = vst [vmem:[%s2168_s27 + $0x48] sm:$0xff] %v1322_v7  ;;  %v1309_v63 = vmul.f32 %v1290_v10, %v1253_v61  ;;  %v1310_v1 = vmul.f32 %v1290_v10, %v1254_v27 }
 0x377   : > { %v1295_v40 = vpop.permute.xlu1 %1294 }
 0x378   : > { %1339 = vst [vmem:[%s2168_s27 + $0x50] sm:$0xff] %v1323_v11  ;;  %1340 = vst [vmem:[%s2168_s27 + $0x58] sm:$0xff] %v1324_v62  ;;  %v1311_v53 = vmul.f32 %v1295_v40, %v1255_v42  ;;  %v1312_v12 = vmul.f32 %v1295_v40, %v1256_v47  ;;  %v1325_v2 = vmax.f32 %v1309_v63, 0.0  ;;  %v1326_v59 = vmax.f32 %v1310_v1, 0.0 }
 0x37a   : > { %v1327_v15 = vmax.f32 %v1311_v53, 0.0  ;;  %v1328_v55 = vmax.f32 %v1312_v12, 0.0  ;;  %1341 = vst [vmem:[%s2168_s27 + $0x60] sm:$0xff] %v1325_v2  ;;  %1342 = vst [vmem:[%s2168_s27 + $0x68] sm:$0xff] %v1326_v59 }
 0x37c   : > { %1343 = vst [vmem:[%s2168_s27 + $0x70] sm:$0xff] %v1327_v15  ;;  %1344 = vst [vmem:[%s2168_s27 + $0x78] sm:$0xff] %v1328_v55 }
 0x37d PF: > { %s1490_s12 = sshll.u32 %s1990_s13, 11  ;;  %s1362_s29 = sshll.u32 %s2168_s27, 4  ;;  %s2622_s29 = int_to_ptr.vmem [resolvable:$true] %s1362_s29 }
 0x37e   : > { %s2619_s20 = scalar_lea.hbm %s2677_s2, %s1490_s12  ;;  %s1346_s18 = scalar_lea.sflag [#allocation7], %s2152_s7 }
 0x37f   : > { %s1902_s8 = scalar_lea.vmem %s2622_s29, 2048  ;;  %s2012_s5 = smov [#allocation10]  }
 0x380   : > { %p1903_p2 = scmp.ne.s32.totalorder %s2622_s29, %s1902_s8  ;;  %s1906_s25 = sshll.u32 %s2012_s5, 4  ;;  %s1907_s25 = int_to_ptr.vmem [resolvable:$false] %s1906_s25 }
 0x381   : > { %s1908_s13 = scalar_lea.vmem %s1907_s25, 4096  ;;  %p1909_p5 = scmp.lt.s32.totalorder %s2622_s29, %s1907_s25 }
 0x382   : > { %p1904_p0 = pnand %p1903_p2, %p2119_p9  ;;  %p1910_p4 = scmp.lt.s32.totalorder %s1908_s13, %s1902_s8 }
 0x384   : > { %p1905_p3 = pneg %p1904_p0  ;;  %p1911_p6 = por %p1910_p4, %p1909_p5 }
 0x386   : > { %p1912_p7 = pnand %p1911_p6, %p1905_p3 }
 0x388   : > { %1915 = shalt.err (!%p1912_p7)
}
 0x389   : > { %s1916_s26 = scalar_lea.hbm %s2619_s20, 2048  ;;  %s1920_s23 = scalar_lea.hbm %s2677_s2, 4096 }
 0x38a   : > { %p1917_p11 = scmp.ne.s32.totalorder %s2619_s20, %s1916_s26  ;;  %p1921_p8 = scmp.lt.s32.totalorder %s2619_s20, %s2677_s2 }
 0x38b   : > { %p1922_p1 = scmp.lt.s32.totalorder %s1920_s23, %s1916_s26 }
 0x38c   : > { %p1918_p13 = pnand %p1917_p11, %p2119_p9 }
 0x38d   : > { %p1923_p12 = por %p1922_p1, %p1921_p8 }
 0x38e   : > { %p1919_p10 = pneg %p1918_p13 }
 0x390   : > { %p1924_p2 = pnand %p1923_p12, %p1919_p10 }
 0x392   : > { %1927 = shalt.err (!%p1924_p2)
}
 0x393   : > { %s2013_s12 = smov 256   ;;  %s2014_s21 = smov 16  }
 0x394   : > { %1657 = dma.vmem_to_hbm [thread:$0]  (%p2119_p9), %s2622_s29, 2048, %s2619_s20, %s1346_s18, %s2013_s12, %s2013_s12, %s2014_s21  }
 0x395 PF: > { %p1674_p0 = scmp.ge.s32.totalorder %s2002_s16, 2  ;;  %s1377_s28 = sand.u32 1, %s1974_s9  }
 0x396   : > { %p2691_p3 = scmp.ne.s32.totalorder %s2684_s22, 0  ;;  %s1378_s8 = scalar_lea.sflag [#allocation7], %s1377_s28 }
 0x398   : > { %p1668_p5 = pnand %p1674_p0, %p2691_p3 }
 0x39a   : > { %p1669_p4 = pneg %p1668_p5 }
 0x39c   : > { %1969 = dma.done.wait (%p1669_p4), %s1378_s8, 2048  }
 0x39d   : > { %1971 = vsyncadd (%p1669_p4), %s1378_s8, 4294965248  ;;  %s19_s16 = sadd.s32 1, %s2002_s16   ;;  %s2692_s9 = smov %s1978_s10 }
 0x39e   : > { %p16_p6 = scmp.ge.s32.totalorder %s19_s16, 6   ;;  %s2693_s10 = smov %s1982_s11 }
 0x39f   : > { %s2694_s11 = smov %s2134_s30  ;;  %s2695_s12 = smov %s1994_s14 }
 0x3a0   : > { %s2696_s13 = smov %s1998_s15  ;;  %s2697_s14 = smov %s2700_s3 }
 0x3a1   : > { %s2698_s15 = smov %s2704_s4  ;;  %18 = sbr.rel (!%p16_p6) target bundleno = 8 (0x8), region = 92 }
 0x3a6   :  { %1383 = vsyncpa [#allocation6], 1 }
 0x3a7   :  { %1385 = vsyncpa [#allocation6 + $0x1], 1 }
 0x3a8   :  { %1386 = vsyncpa [#allocation9], 1 }
 0x3a9   :  { %1387 = vsyncpa [#allocation7], 1 }
 0x3aa   :  { %1389 = vsyncpa [#allocation7 + $0x1], 1 }

</bundles_post_ra>
